<compile_context>
chip_gen: v7x
topology: tpu7x:2x2x1
jax: 0.10.0
libtpu: 0.0.40
codegen_flags: <defaults>
</compile_context>

<pallas_src>
import functools
import math

import jax
import jax.numpy as jnp
from jax import lax
from jax.experimental import pallas as pl
from jax.experimental.pallas import tpu as pltpu


def _gelu_exact(x):
    # torch.nn.GELU default (erf-based)
    return 0.5 * x * (1.0 + lax.erf(x / jnp.sqrt(jnp.float32(2.0))))


def _slab_layout(D):
    """Row offsets of the per-layer weight slab (8-aligned blocks)."""
    blk = ((D + 7) // 8) * 8              # stride between the two DxD weight blocks
    rows = ((2 * blk + 2 + 7) // 8) * 8   # wwfa@0, wwfb@blk, wcv@2*blk, bias@2*blk+1
    return blk, rows


# ---------------------------------------------------------------------------
# Fused kernel: conv1 -> conv2 -> link-prediction head
# ---------------------------------------------------------------------------
def net_kernel(sel_ref, sdstT_ref, ew_ref, x0_ref, w_ref, sc_ref, out_ref,
               *, E, P, F, pairs):
    f32 = jnp.float32
    HI = lax.Precision.HIGHEST
    D = P + F
    blk, _ = _slab_layout(D)

    # [1, D] lane mask: coordinate lanes (first P) vs feature lanes (last F).
    lane = lax.broadcasted_iota(jnp.int32, (1, D), 1)
    is_coor = lane < P
    cmask = is_coor.astype(f32)

    ew = ew_ref[...]                                         # [E, 1] f32 (gcn-normalized)

    def conv_layer(x, layer):
        # folded scalars: edge-MLP affine (ea, ec) and coors-MLP offset (cc)
        ea = sc_ref[3 * layer + 0]
        ec = sc_ref[3 * layer + 1]
        cc = sc_ref[3 * layer + 2]
        wl = w_ref[layer]                                    # [rows, D] f32
        wwfa = wl[0:D, :]                                    # [D, D] zero-padded W_withformer[:F]
        wwfb = wl[blk:blk + D, :]                            # [D, D] zero-padded W_withformer[F:]
        wcv = wl[2 * blk:2 * blk + 1, :]                     # [1, D] folded coors_mlp (phase baked in)
        bias = wl[2 * blk + 1:2 * blk + 2, :]                # [1, D] zero-padded bias

        # --- fused gather: both edge endpoints of [coors|feats] in ONE matmul
        se = sel_ref[0:2 * E, :].astype(f32)                 # widened per use (not kept live)
        g = jnp.dot(se, x, preferred_element_type=f32, precision=HI)     # [2E, D]
        src = g[0:E, :]                                      # [coors_src | x_j]
        dst = g[E:2 * E, :]                                  # [coors_dst | x_i]
        diff = src - dst                                     # coord lanes = rel_coors

        rel_dist = jnp.sum(cmask * diff * diff, axis=-1, keepdims=True)  # [E, 1]
        gate = jax.nn.sigmoid(rel_dist * ea + ec)            # folded edge MLP + sigmoid
        gew = gate * ew                                      # [E, 1]

        # folded coors_mlp(m_ij); CoorsNorm phase pre-multiplied into wcv / cc
        cw = gew * jnp.sum(src * wcv, axis=-1, keepdims=True) + cc       # [E, 1]
        inv_nrm = jnp.minimum(lax.rsqrt(rel_dist), jnp.float32(1e8))     # 1/clamp(|rel|,1e-8)

        # --- one [E, D] message slab: coord lanes carry the coordinate message,
        # feature lanes carry m_ij -> ONE scatter matmul handles both.
        msg = jnp.where(is_coor, (cw * inv_nrm) * diff, gew * src)       # [E, D]
        sdT = sdstT_ref[...].astype(f32)                                 # [N, E] (pre-transposed)
        agg = jnp.dot(sdT, msg, preferred_element_type=f32, precision=HI)  # [N, D] = [mhat | m_i]

        # --- node update: coords <- coors + mhat ; feats <- cat([feats, m_i]) @ W + b
        return (cmask * (x + agg)
                + jnp.dot(x, wwfa, preferred_element_type=f32, precision=HI)
                + jnp.dot(agg, wwfb, preferred_element_type=f32, precision=HI)
                + bias)

    x1 = conv_layer(x0_ref[...], 0)
    x2 = conv_layer(x1, 1)

    # --- link-prediction head: both pair endpoints gathered in ONE matmul;
    # pred / positional-encoding / fc reduced by ONE dot; lane-dense output.
    sh = sel_ref[2 * E:2 * E + 2 * pairs, :].astype(f32)
    gh = jnp.dot(sh, x2, preferred_element_type=f32, precision=HI)       # [2*pairs, D]
    u = gh[0:pairs, :]
    v = gh[pairs:2 * pairs, :]
    fc_pred = sc_ref[6]
    fc_pe = sc_ref[7]
    fc_bias = sc_ref[8]
    duv = u - v
    m = jnp.where(is_coor, fc_pe * (duv * duv), fc_pred * (u * v))       # [pairs, D]
    ones_row = jnp.ones((1, D), f32)
    out_ref[...] = lax.dot_general(
        ones_row, m, (((1,), (1,)), ((), ())),
        preferred_element_type=f32, precision=HI) + fc_bias              # [1, pairs]


# ---------------------------------------------------------------------------
# Plain-JAX glue: gcn_norm (self-loops + symmetric normalization), param folds
# ---------------------------------------------------------------------------
def gcn_norm_dense(edge_index, num_nodes):
    # edge_weight=None -> ones; add_remaining_self_loops with fill_value=1.0
    row0, col0 = edge_index[0], edge_index[1]
    ew0 = jnp.ones((edge_index.shape[1],), jnp.float32)
    loop = jnp.arange(num_nodes, dtype=edge_index.dtype)
    row = jnp.concatenate([row0, loop])
    col = jnp.concatenate([col0, loop])
    ew = jnp.concatenate([ew0, jnp.ones((num_nodes,), jnp.float32)])
    deg = jax.ops.segment_sum(ew, col, num_segments=num_nodes)
    deg_inv_sqrt = jnp.where(deg > 0, 1.0 / jnp.sqrt(deg), 0.0)
    norm = deg_inv_sqrt[row] * ew * deg_inv_sqrt[col]
    return row, col, norm


def fold_conv_params(p, P, F):
    """Fold the activation-free MLPs / degenerate LayerNorm(1)+GELU and pre-pad weights."""
    D = P + F
    blk, rows = _slab_layout(D)
    # edge MLP: Linear(1,32);Linear(32,1), no nonlinearity between -> scalar affine.
    ea = (p["w1t"] @ p["w2t"]).reshape(())
    ec = (p["b1"] @ p["w2t"]).reshape(()) + p["b2"].reshape(())
    # CoorsNorm: LayerNorm over a size-1 dim normalizes to exactly 0, so its output
    # is ln_bias for any input; phase = GELU(ln_bias) is a per-layer constant.
    phase = _gelu_exact(p["ln_b"].reshape(()))
    # coors_mlp: Linear(m,4m);Linear(4m,1), no nonlinearity -> affine; phase folded in.
    wcv = (p["wc1t"] @ p["wc2t"]).reshape(1, -1) * phase                  # [1, F]
    cc = ((p["bc1"] @ p["wc2t"]).reshape(()) + p["bc2"].reshape(())) * phase
    scalars = jnp.stack([ea, ec, cc]).astype(jnp.float32)                 # (3,)

    # Zero-pad weights in the wrapper so the kernel never needs lane concats.
    wwfa_pad = jnp.pad(p["wwf"][:F, :], ((P, 0), (P, 0)))                 # [D, D]
    wwfb_pad = jnp.pad(p["wwf"][F:, :], ((P, 0), (P, 0)))                 # [D, D]
    wcv_pad = jnp.pad(wcv, ((0, 0), (P, 0)))                              # [1, D]
    bias_pad = jnp.pad(p["bias"], ((0, 0), (P, 0)))                       # [1, D]
    slab = jnp.zeros((rows, D), jnp.float32)
    slab = slab.at[0:D].set(wwfa_pad)
    slab = slab.at[blk:blk + D].set(wwfb_pad)
    slab = slab.at[2 * blk].set(wcv_pad[0])
    slab = slab.at[2 * blk + 1].set(bias_pad[0])
    return scalars, slab


def net_forward(params, x, edge_index, idx, pos_dim):
    f32, bf16 = jnp.float32, jnp.bfloat16
    N = int(x.shape[0])
    P = int(pos_dim)
    D = int(x.shape[1])
    F = D - P
    pairs = int(idx.shape[1])

    row, col, norm = gcn_norm_dense(edge_index, N)
    E = int(row.shape[0])
    EP = ((E + 7) // 8) * 8            # pad edges to a sublane multiple (zero rows are no-ops)
    PH = ((pairs + 7) // 8) * 8        # pad link pairs to a sublane multiple

    # 0/1 selectors in bf16 (exact; half the bytes of f32 one-hots).
    ssrc = jnp.pad(jax.nn.one_hot(row, N, dtype=bf16), ((0, EP - E), (0, 0)))
    sdst = jnp.pad(jax.nn.one_hot(col, N, dtype=bf16), ((0, EP - E), (0, 0)))
    g0 = jnp.pad(jax.nn.one_hot(idx[0], N, dtype=bf16), ((0, PH - pairs), (0, 0)))
    g1 = jnp.pad(jax.nn.one_hot(idx[1], N, dtype=bf16), ((0, PH - pairs), (0, 0)))
    sel = jnp.concatenate([ssrc, sdst, g0, g1], axis=0)                   # [2EP+2PH, N] bf16
    sdstT = sdst.T                                                        # [N, EP] bf16 (pre-transposed)
    ew = jnp.pad(norm[:, None].astype(f32), ((0, EP - E), (0, 0)))        # [EP, 1]
    x0 = x.astype(f32)                                                    # [N, D] = [coors | feats]

    sc1, w1 = fold_conv_params(params["conv1"], P, F)
    sc2, w2 = fold_conv_params(params["conv2"], P, F)
    wslab = jnp.stack([w1, w2])                                           # [2, rows, D] f32
    fc_w, fc_b = params["fc_w"], params["fc_b"]                           # [1,2], [1]
    scal = jnp.concatenate(
        [sc1, sc2, jnp.stack([fc_w[0, 0], fc_w[0, 1], fc_b[0]]),
         jnp.zeros((7,), f32)]).astype(f32)                               # (16,) SMEM

    vmem = pl.BlockSpec(memory_space=pltpu.VMEM)
    smem = pl.BlockSpec(memory_space=pltpu.SMEM)

    cost = pl.CostEstimate(
        flops=int(2 * (2 * 2 * EP * N * D)          # conv gathers
                  + 2 * (2 * N * EP * D)            # conv scatters
                  + 2 * (2 * 2 * N * D * D)         # node updates
                  + 2 * 2 * PH * N * D + 2 * D * PH),   # head
        transcendentals=int(6 * EP),
        bytes_accessed=int(2 * sel.size + 2 * sdstT.size
                           + 4 * (ew.size + x0.size + wslab.size + scal.size)
                           + 4 * PH))

    kernel = functools.partial(net_kernel, E=EP, P=P, F=F, pairs=PH)
    out_row = pl.pallas_call(
        kernel,
        out_shape=jax.ShapeDtypeStruct((1, PH), f32),
        in_specs=[vmem, vmem, vmem, vmem, vmem, smem],
        out_specs=pl.BlockSpec(memory_space=pltpu.VMEM),
        cost_estimate=cost,
    )(sel, sdstT, ew, x0, wslab, scal)
    return out_row[:, :pairs].reshape(pairs, 1)


# ---------------------------------------------------------------------------
# Deterministic parameter init (mirrors AnoGCNConv.__init__ / Net.__init__)
# ---------------------------------------------------------------------------
def _linear_init(key, out_dim, in_dim):
    k1, k2 = jax.random.split(key)
    bound = 1.0 / math.sqrt(in_dim)
    w = jax.random.uniform(k1, (out_dim, in_dim), jnp.float32, -bound, bound)
    b = jax.random.uniform(k2, (out_dim,), jnp.float32, -bound, bound)
    return w, b


def init_conv_params(key, feats_dim, m_dim):
    ks = jax.random.split(key, 5)
    w1, b1 = _linear_init(ks[0], 32, 1)               # edge_mlp1
    w2, b2 = _linear_init(ks[1], 1, 32)               # edge_mlp2
    wc1, bc1 = _linear_init(ks[2], m_dim * 4, m_dim)  # coors_mlp[0]
    wc2, bc2 = _linear_init(ks[3], 1, m_dim * 4)      # coors_mlp[1]
    # glorot for weight_withformer [feats_dim + m_dim, feats_dim]
    stdv = math.sqrt(6.0 / ((feats_dim + m_dim) + feats_dim))
    wwf = jax.random.uniform(ks[4], (feats_dim + m_dim, feats_dim),
                             jnp.float32, -stdv, stdv)
    return dict(
        w1t=jnp.transpose(w1), b1=b1[None, :],
        w2t=jnp.transpose(w2), b2=b2[None, :],
        wc1t=jnp.transpose(wc1), bc1=bc1[None, :],
        wc2t=jnp.transpose(wc2), bc2=bc2[None, :],
        ln_b=jnp.zeros((1, 1), jnp.float32),           # LayerNorm(1) bias (weight is a no-op)
        wwf=wwf,                                       # weight_withformer, kept whole
        bias=jnp.zeros((1, feats_dim), jnp.float32),   # zeros() init
    )


if __name__ == "__main__":
    POS_DIM, FEATS_DIM, M_DIM, N_NODES = 3, 8, 8, 8

    key = jax.random.PRNGKey(0)
    kx, kc1, kc2, kfc = jax.random.split(key, 4)

    # input node matrix: [N, pos_dim + feats_dim]
    x = jax.random.normal(kx, (N_NODES, POS_DIM + FEATS_DIM), jnp.float32)

    # small ring graph (no self-loops in the input; gcn_norm adds them)
    src = jnp.array([0, 1, 1, 2, 2, 3, 3, 4, 4, 5, 5, 6, 6, 7, 0, 7], jnp.int32)
    dst = jnp.array([1, 0, 2, 1, 3, 2, 4, 3, 5, 4, 6, 5, 7, 6, 7, 0], jnp.int32)
    edge_index = jnp.stack([src, dst])                 # [2, 16]

    # link-prediction query pairs
    idx = jnp.array([[0, 2, 4, 6], [1, 3, 5, 7]], jnp.int32)   # [2, 4]

    fc_w, fc_b = _linear_init(kfc, 1, 2)               # nn.Linear(2, 1)
    params = dict(
        conv1=init_conv_params(kc1, FEATS_DIM, M_DIM),
        conv2=init_conv_params(kc2, FEATS_DIM, M_DIM),
        fc_w=fc_w,                                      # [1, 2]
        fc_b=fc_b,                                      # [1]
    )

    out = net_forward(params, x, edge_index, idx, POS_DIM)
    jax.block_until_ready(out)
    assert out.shape == (idx.shape[1], 1)
    print("KERNEL_OK")
</pallas_src>

<mosaic_0001>
module attributes {stable_mosaic.version = 11 : i64} {
  func.func @net_kernel(%arg0: memref<64x8xbf16, #tpu.memory_space<vmem>>, %arg1: memref<8x24xbf16, #tpu.memory_space<vmem>>, %arg2: memref<24x1xf32, #tpu.memory_space<vmem>>, %arg3: memref<8x11xf32, #tpu.memory_space<vmem>>, %arg4: memref<2x40x11xf32, #tpu.memory_space<vmem>>, %arg5: memref<16xf32, #tpu.memory_space<smem>>, %arg6: memref<1x8xf32, #tpu.memory_space<vmem>>) attributes {dimension_semantics = [], scalar_prefetch = 0 : i64, scratch_operands = 0 : i64, tpu.core_type = #tpu.core_type<tc>} {
    %0 = tpu.iota {dimensions = array<i32: 1>} : vector<1x11xi32>
    %c3_i32 = arith.constant 3 : i32
    %1 = vector.broadcast %c3_i32 : i32 to vector<1x11xi32>
    %2 = arith.cmpi slt, %0, %1 : vector<1x11xi32>
    %3 = arith.extui %2 : vector<1x11xi1> to vector<1x11xi32>
    %4 = arith.sitofp %3 : vector<1x11xi32> to vector<1x11xf32>
    %c0 = arith.constant 0 : index
    %c0_0 = arith.constant 0 : index
    %5 = vector.load %arg2[%c0, %c0_0] : memref<24x1xf32, #tpu.memory_space<vmem>>, vector<24x1xf32>
    %c0_1 = arith.constant 0 : index
    %c0_2 = arith.constant 0 : index
    %6 = vector.load %arg3[%c0_1, %c0_2] : memref<8x11xf32, #tpu.memory_space<vmem>>, vector<8x11xf32>
    %c0_3 = arith.constant 0 : index
    %7 = memref.load %arg5[%c0_3] : memref<16xf32, #tpu.memory_space<smem>>
    %c1 = arith.constant 1 : index
    %8 = memref.load %arg5[%c1] : memref<16xf32, #tpu.memory_space<smem>>
    %c2 = arith.constant 2 : index
    %9 = memref.load %arg5[%c2] : memref<16xf32, #tpu.memory_space<smem>>
    %c0_4 = arith.constant 0 : index
    %c0_5 = arith.constant 0 : index
    %c0_6 = arith.constant 0 : index
    %10 = vector.load %arg4[%c0_4, %c0_5, %c0_6] : memref<2x40x11xf32, #tpu.memory_space<vmem>>, vector<1x40x11xf32>
    %11 = vector.shape_cast %10 : vector<1x40x11xf32> to vector<40x11xf32>
    %12 = vector.extract_strided_slice %11 {offsets = [0, 0], sizes = [11, 11], strides = [1, 1]} : vector<40x11xf32> to vector<11x11xf32>
    %13 = vector.extract_strided_slice %11 {offsets = [16, 0], sizes = [11, 11], strides = [1, 1]} : vector<40x11xf32> to vector<11x11xf32>
    %14 = vector.extract_strided_slice %11 {offsets = [32, 0], sizes = [1, 11], strides = [1, 1]} : vector<40x11xf32> to vector<1x11xf32>
    %15 = vector.extract_strided_slice %11 {offsets = [33, 0], sizes = [1, 11], strides = [1, 1]} : vector<40x11xf32> to vector<1x11xf32>
    %c0_7 = arith.constant 0 : index
    %c0_8 = arith.constant 0 : index
    %16 = vector.load %arg0[%c0_7, %c0_8] : memref<64x8xbf16, #tpu.memory_space<vmem>>, vector<48x8xbf16>
    %17 = arith.extf %16 : vector<48x8xbf16> to vector<48x8xf32>
    %cst = arith.constant dense<0.000000e+00> : vector<48x11xf32>
    %18 = tpu.matmul %17, %6, %cst {dimension_numbers = #tpu.dot_dimension_numbers<[1], [0], [0], [1], [0, 0, 1, 1], [], []>, precision = #tpu.contract_precision<fp32>} : vector<48x8xf32>, vector<8x11xf32>, vector<48x11xf32> -> vector<48x11xf32>
    %19 = vector.extract_strided_slice %18 {offsets = [0, 0], sizes = [24, 11], strides = [1, 1]} : vector<48x11xf32> to vector<24x11xf32>
    %20 = vector.extract_strided_slice %18 {offsets = [24, 0], sizes = [24, 11], strides = [1, 1]} : vector<48x11xf32> to vector<24x11xf32>
    %21 = arith.subf %19, %20 : vector<24x11xf32>
    %22 = vector.broadcast %4 : vector<1x11xf32> to vector<24x11xf32>
    %23 = arith.mulf %22, %21 : vector<24x11xf32>
    %24 = arith.mulf %23, %21 : vector<24x11xf32>
    %cst_9 = arith.constant dense<0.000000e+00> : vector<24xf32>
    %25 = vector.multi_reduction <add>, %24, %cst_9 [1] : vector<24x11xf32> to vector<24xf32>
    %26 = vector.shape_cast %25 : vector<24xf32> to vector<24x1xf32>
    %27 = vector.broadcast %7 : f32 to vector<24x1xf32>
    %28 = arith.mulf %26, %27 : vector<24x1xf32>
    %29 = vector.broadcast %8 : f32 to vector<24x1xf32>
    %30 = arith.addf %28, %29 : vector<24x1xf32>
    %31 = arith.negf %30 : vector<24x1xf32>
    %32 = math.exp %31 : vector<24x1xf32>
    %cst_10 = arith.constant 1.000000e+00 : f32
    %33 = vector.broadcast %cst_10 : f32 to vector<24x1xf32>
    %34 = arith.addf %33, %32 : vector<24x1xf32>
    %35 = arith.divf %33, %34 : vector<24x1xf32>
    %36 = arith.mulf %35, %5 : vector<24x1xf32>
    %37 = vector.broadcast %14 : vector<1x11xf32> to vector<24x11xf32>
    %38 = arith.mulf %19, %37 : vector<24x11xf32>
    %cst_11 = arith.constant dense<0.000000e+00> : vector<24xf32>
    %39 = vector.multi_reduction <add>, %38, %cst_11 [1] : vector<24x11xf32> to vector<24xf32>
    %40 = vector.shape_cast %39 : vector<24xf32> to vector<24x1xf32>
    %41 = arith.mulf %36, %40 : vector<24x1xf32>
    %42 = vector.broadcast %9 : f32 to vector<24x1xf32>
    %43 = arith.addf %41, %42 : vector<24x1xf32>
    %44 = math.rsqrt %26 : vector<24x1xf32>
    %cst_12 = arith.constant 1.000000e+08 : f32
    %45 = vector.broadcast %cst_12 : f32 to vector<24x1xf32>
    %46 = arith.minimumf %44, %45 : vector<24x1xf32>
    %47 = arith.mulf %43, %46 : vector<24x1xf32>
    %48 = vector.broadcast %47 : vector<24x1xf32> to vector<24x11xf32>
    %49 = arith.mulf %48, %21 : vector<24x11xf32>
    %50 = vector.broadcast %36 : vector<24x1xf32> to vector<24x11xf32>
    %51 = arith.mulf %50, %19 : vector<24x11xf32>
    %52 = vector.shape_cast %2 : vector<1x11xi1> to vector<1x11xi1>
    %53 = vector.broadcast %52 : vector<1x11xi1> to vector<24x11xi1>
    %54 = arith.select %53, %49, %51 : vector<24x11xi1>, vector<24x11xf32>
    %c0_13 = arith.constant 0 : index
    %c0_14 = arith.constant 0 : index
    %55 = vector.load %arg1[%c0_13, %c0_14] : memref<8x24xbf16, #tpu.memory_space<vmem>>, vector<8x24xbf16>
    %56 = arith.extf %55 : vector<8x24xbf16> to vector<8x24xf32>
    %cst_15 = arith.constant dense<0.000000e+00> : vector<8x11xf32>
    %57 = tpu.matmul %56, %54, %cst_15 {dimension_numbers = #tpu.dot_dimension_numbers<[1], [0], [0], [1], [0, 0, 1, 1], [], []>, precision = #tpu.contract_precision<fp32>} : vector<8x24xf32>, vector<24x11xf32>, vector<8x11xf32> -> vector<8x11xf32>
    %58 = arith.addf %6, %57 : vector<8x11xf32>
    %59 = vector.broadcast %4 : vector<1x11xf32> to vector<8x11xf32>
    %60 = arith.mulf %59, %58 : vector<8x11xf32>
    %cst_16 = arith.constant dense<0.000000e+00> : vector<8x11xf32>
    %61 = tpu.matmul %6, %12, %cst_16 {dimension_numbers = #tpu.dot_dimension_numbers<[1], [0], [0], [1], [0, 0, 1, 1], [], []>, precision = #tpu.contract_precision<fp32>} : vector<8x11xf32>, vector<11x11xf32>, vector<8x11xf32> -> vector<8x11xf32>
    %62 = arith.addf %60, %61 : vector<8x11xf32>
    %cst_17 = arith.constant dense<0.000000e+00> : vector<8x11xf32>
    %63 = tpu.matmul %57, %13, %cst_17 {dimension_numbers = #tpu.dot_dimension_numbers<[1], [0], [0], [1], [0, 0, 1, 1], [], []>, precision = #tpu.contract_precision<fp32>} : vector<8x11xf32>, vector<11x11xf32>, vector<8x11xf32> -> vector<8x11xf32>
    %64 = arith.addf %62, %63 : vector<8x11xf32>
    %65 = vector.broadcast %15 : vector<1x11xf32> to vector<8x11xf32>
    %66 = arith.addf %64, %65 : vector<8x11xf32>
    %c3 = arith.constant 3 : index
    %67 = memref.load %arg5[%c3] : memref<16xf32, #tpu.memory_space<smem>>
    %c4 = arith.constant 4 : index
    %68 = memref.load %arg5[%c4] : memref<16xf32, #tpu.memory_space<smem>>
    %c5 = arith.constant 5 : index
    %69 = memref.load %arg5[%c5] : memref<16xf32, #tpu.memory_space<smem>>
    %c1_18 = arith.constant 1 : index
    %c0_19 = arith.constant 0 : index
    %c0_20 = arith.constant 0 : index
    %70 = vector.load %arg4[%c1_18, %c0_19, %c0_20] : memref<2x40x11xf32, #tpu.memory_space<vmem>>, vector<1x40x11xf32>
    %71 = vector.shape_cast %70 : vector<1x40x11xf32> to vector<40x11xf32>
    %72 = vector.extract_strided_slice %71 {offsets = [0, 0], sizes = [11, 11], strides = [1, 1]} : vector<40x11xf32> to vector<11x11xf32>
    %73 = vector.extract_strided_slice %71 {offsets = [16, 0], sizes = [11, 11], strides = [1, 1]} : vector<40x11xf32> to vector<11x11xf32>
    %74 = vector.extract_strided_slice %71 {offsets = [32, 0], sizes = [1, 11], strides = [1, 1]} : vector<40x11xf32> to vector<1x11xf32>
    %75 = vector.extract_strided_slice %71 {offsets = [33, 0], sizes = [1, 11], strides = [1, 1]} : vector<40x11xf32> to vector<1x11xf32>
    %c0_21 = arith.constant 0 : index
    %c0_22 = arith.constant 0 : index
    %76 = vector.load %arg0[%c0_21, %c0_22] : memref<64x8xbf16, #tpu.memory_space<vmem>>, vector<48x8xbf16>
    %77 = arith.extf %76 : vector<48x8xbf16> to vector<48x8xf32>
    %cst_23 = arith.constant dense<0.000000e+00> : vector<48x11xf32>
    %78 = tpu.matmul %77, %66, %cst_23 {dimension_numbers = #tpu.dot_dimension_numbers<[1], [0], [0], [1], [0, 0, 1, 1], [], []>, precision = #tpu.contract_precision<fp32>} : vector<48x8xf32>, vector<8x11xf32>, vector<48x11xf32> -> vector<48x11xf32>
    %79 = vector.extract_strided_slice %78 {offsets = [0, 0], sizes = [24, 11], strides = [1, 1]} : vector<48x11xf32> to vector<24x11xf32>
    %80 = vector.extract_strided_slice %78 {offsets = [24, 0], sizes = [24, 11], strides = [1, 1]} : vector<48x11xf32> to vector<24x11xf32>
    %81 = arith.subf %79, %80 : vector<24x11xf32>
    %82 = vector.broadcast %4 : vector<1x11xf32> to vector<24x11xf32>
    %83 = arith.mulf %82, %81 : vector<24x11xf32>
    %84 = arith.mulf %83, %81 : vector<24x11xf32>
    %cst_24 = arith.constant dense<0.000000e+00> : vector<24xf32>
    %85 = vector.multi_reduction <add>, %84, %cst_24 [1] : vector<24x11xf32> to vector<24xf32>
    %86 = vector.shape_cast %85 : vector<24xf32> to vector<24x1xf32>
    %87 = vector.broadcast %67 : f32 to vector<24x1xf32>
    %88 = arith.mulf %86, %87 : vector<24x1xf32>
    %89 = vector.broadcast %68 : f32 to vector<24x1xf32>
    %90 = arith.addf %88, %89 : vector<24x1xf32>
    %91 = arith.negf %90 : vector<24x1xf32>
    %92 = math.exp %91 : vector<24x1xf32>
    %cst_25 = arith.constant 1.000000e+00 : f32
    %93 = vector.broadcast %cst_25 : f32 to vector<24x1xf32>
    %94 = arith.addf %93, %92 : vector<24x1xf32>
    %95 = arith.divf %93, %94 : vector<24x1xf32>
    %96 = arith.mulf %95, %5 : vector<24x1xf32>
    %97 = vector.broadcast %74 : vector<1x11xf32> to vector<24x11xf32>
    %98 = arith.mulf %79, %97 : vector<24x11xf32>
    %cst_26 = arith.constant dense<0.000000e+00> : vector<24xf32>
    %99 = vector.multi_reduction <add>, %98, %cst_26 [1] : vector<24x11xf32> to vector<24xf32>
    %100 = vector.shape_cast %99 : vector<24xf32> to vector<24x1xf32>
    %101 = arith.mulf %96, %100 : vector<24x1xf32>
    %102 = vector.broadcast %69 : f32 to vector<24x1xf32>
    %103 = arith.addf %101, %102 : vector<24x1xf32>
    %104 = math.rsqrt %86 : vector<24x1xf32>
    %cst_27 = arith.constant 1.000000e+08 : f32
    %105 = vector.broadcast %cst_27 : f32 to vector<24x1xf32>
    %106 = arith.minimumf %104, %105 : vector<24x1xf32>
    %107 = arith.mulf %103, %106 : vector<24x1xf32>
    %108 = vector.broadcast %107 : vector<24x1xf32> to vector<24x11xf32>
    %109 = arith.mulf %108, %81 : vector<24x11xf32>
    %110 = vector.broadcast %96 : vector<24x1xf32> to vector<24x11xf32>
    %111 = arith.mulf %110, %79 : vector<24x11xf32>
    %112 = vector.shape_cast %2 : vector<1x11xi1> to vector<1x11xi1>
    %113 = vector.broadcast %112 : vector<1x11xi1> to vector<24x11xi1>
    %114 = arith.select %113, %109, %111 : vector<24x11xi1>, vector<24x11xf32>
    %c0_28 = arith.constant 0 : index
    %c0_29 = arith.constant 0 : index
    %115 = vector.load %arg1[%c0_28, %c0_29] : memref<8x24xbf16, #tpu.memory_space<vmem>>, vector<8x24xbf16>
    %116 = arith.extf %115 : vector<8x24xbf16> to vector<8x24xf32>
    %cst_30 = arith.constant dense<0.000000e+00> : vector<8x11xf32>
    %117 = tpu.matmul %116, %114, %cst_30 {dimension_numbers = #tpu.dot_dimension_numbers<[1], [0], [0], [1], [0, 0, 1, 1], [], []>, precision = #tpu.contract_precision<fp32>} : vector<8x24xf32>, vector<24x11xf32>, vector<8x11xf32> -> vector<8x11xf32>
    %118 = arith.addf %66, %117 : vector<8x11xf32>
    %119 = vector.broadcast %4 : vector<1x11xf32> to vector<8x11xf32>
    %120 = arith.mulf %119, %118 : vector<8x11xf32>
    %cst_31 = arith.constant dense<0.000000e+00> : vector<8x11xf32>
    %121 = tpu.matmul %66, %72, %cst_31 {dimension_numbers = #tpu.dot_dimension_numbers<[1], [0], [0], [1], [0, 0, 1, 1], [], []>, precision = #tpu.contract_precision<fp32>} : vector<8x11xf32>, vector<11x11xf32>, vector<8x11xf32> -> vector<8x11xf32>
    %122 = arith.addf %120, %121 : vector<8x11xf32>
    %cst_32 = arith.constant dense<0.000000e+00> : vector<8x11xf32>
    %123 = tpu.matmul %117, %73, %cst_32 {dimension_numbers = #tpu.dot_dimension_numbers<[1], [0], [0], [1], [0, 0, 1, 1], [], []>, precision = #tpu.contract_precision<fp32>} : vector<8x11xf32>, vector<11x11xf32>, vector<8x11xf32> -> vector<8x11xf32>
    %124 = arith.addf %122, %123 : vector<8x11xf32>
    %125 = vector.broadcast %75 : vector<1x11xf32> to vector<8x11xf32>
    %126 = arith.addf %124, %125 : vector<8x11xf32>
    %c48 = arith.constant 48 : index
    %c0_33 = arith.constant 0 : index
    %127 = vector.load %arg0[%c48, %c0_33] : memref<64x8xbf16, #tpu.memory_space<vmem>>, vector<16x8xbf16>
    %128 = arith.extf %127 : vector<16x8xbf16> to vector<16x8xf32>
    %cst_34 = arith.constant dense<0.000000e+00> : vector<16x11xf32>
    %129 = tpu.matmul %128, %126, %cst_34 {dimension_numbers = #tpu.dot_dimension_numbers<[1], [0], [0], [1], [0, 0, 1, 1], [], []>, precision = #tpu.contract_precision<fp32>} : vector<16x8xf32>, vector<8x11xf32>, vector<16x11xf32> -> vector<16x11xf32>
    %130 = vector.extract_strided_slice %129 {offsets = [0, 0], sizes = [8, 11], strides = [1, 1]} : vector<16x11xf32> to vector<8x11xf32>
    %131 = vector.extract_strided_slice %129 {offsets = [8, 0], sizes = [8, 11], strides = [1, 1]} : vector<16x11xf32> to vector<8x11xf32>
    %c6 = arith.constant 6 : index
    %132 = memref.load %arg5[%c6] : memref<16xf32, #tpu.memory_space<smem>>
    %c7 = arith.constant 7 : index
    %133 = memref.load %arg5[%c7] : memref<16xf32, #tpu.memory_space<smem>>
    %c8 = arith.constant 8 : index
    %134 = memref.load %arg5[%c8] : memref<16xf32, #tpu.memory_space<smem>>
    %135 = arith.subf %130, %131 : vector<8x11xf32>
    %136 = arith.mulf %135, %135 : vector<8x11xf32>
    %137 = vector.broadcast %133 : f32 to vector<8x11xf32>
    %138 = arith.mulf %137, %136 : vector<8x11xf32>
    %139 = arith.mulf %130, %131 : vector<8x11xf32>
    %140 = vector.broadcast %132 : f32 to vector<8x11xf32>
    %141 = arith.mulf %140, %139 : vector<8x11xf32>
    %142 = vector.shape_cast %2 : vector<1x11xi1> to vector<1x11xi1>
    %143 = vector.broadcast %142 : vector<1x11xi1> to vector<8x11xi1>
    %144 = arith.select %143, %138, %141 : vector<8x11xi1>, vector<8x11xf32>
    %cst_35 = arith.constant 1.000000e+00 : f32
    %145 = vector.broadcast %cst_35 : f32 to vector<1x11xf32>
    %cst_36 = arith.constant dense<0.000000e+00> : vector<1x8xf32>
    %146 = tpu.matmul %145, %144, %cst_36 {dimension_numbers = #tpu.dot_dimension_numbers<[1], [1], [0], [0], [0, 0, 1, 0], [], []>, precision = #tpu.contract_precision<fp32>} : vector<1x11xf32>, vector<8x11xf32>, vector<1x8xf32> -> vector<1x8xf32>
    %147 = vector.broadcast %134 : f32 to vector<1x8xf32>
    %148 = arith.addf %146, %147 : vector<1x8xf32>
    %c0_37 = arith.constant 0 : index
    %c0_38 = arith.constant 0 : index
    %149 = vector.load %arg6[%c0_37, %c0_38] : memref<1x8xf32, #tpu.memory_space<vmem>>, vector<1x8xf32>
    tpu.vector_store %arg6[%c0_37, %c0_38], %148 {strides = array<i32>} : memref<1x8xf32, #tpu.memory_space<vmem>>, vector<1x8xf32>,
    return
  }
}

</mosaic_0001>

<bundles_post_ra>
// kernel: tpu_custom_call.1
= control target key start
LH: loop header
LB: loop body
LE: loop exit
PB: predicated region body
PF: predicated region fallthrough
CT: control target
= control target key end

     0   :  { %11 = vsyncpa [#allocation4], 0  ;;  %s7195_s0 = inlined_call_operand.vmem [shape: bf16[64,8], index: 0, kind: input, shape index: {}]   ;;  %s7196_s1 = inlined_call_operand.vmem [shape: bf16[8,24], index: 1, kind: input, shape index: {}]   ;;  %s7197_s2 = inlined_call_operand.vmem [shape: f32[24,1], index: 2, kind: input, shape index: {}]   ;;  %s7198_s3 = inlined_call_operand.vmem [shape: f32[8,11], index: 3, kind: input, shape index: {}]   ;;  %s7199_s4 = inlined_call_operand.vmem [shape: f32[2,40,11], index: 4, kind: input, shape index: {}]   ;;  %s7200_s5 = inlined_call_operand.vmem [shape: f32[16], index: 5, kind: input, shape index: {}]   ;;  %s7201_s6 = inlined_call_operand.hbm [shape: f32[1,8], index: 6, kind: output, shape index: {}]  }
   0x1   :  { %12 = vsyncpa [#allocation3], 0  ;;  %s29_s23 = sshll.u32 %s7200_s5, 4  ;;  %s30_s23 = int_to_ptr.vmem [resolvable:$true] %s29_s23 }
   0x2   :  { %s6509_s24 = scalar_lea.vmem %s30_s23, 16  ;;  %p6514_p1 = scmp.lt.s32.totalorder %s30_s23, %s30_s23 }
   0x3   :  { %p6510_p0 = scmp.ne.s32.totalorder %s30_s23, %s6509_s24  ;;  %p6515_p2 = scmp.lt.s32.totalorder %s6509_s24, %s6509_s24 }
   0x5   :  { %p6516_p3 = por %p6515_p2, %p6514_p1 }
   0x7   :  { %p6517_p4 = pnand %p6516_p3, %p6510_p0 }
   0x9   :  { %6520 = shalt.err (!%p6517_p4)
}
   0xa   :  { %s6547_s25 = smov [#allocation2]  }
   0xb   :  { %32 = dma.vmem_to_smem %s30_s23, 16, %s6547_s25, [#allocation4]  }
   0xc   :  { %6543 = dma.done.wait [#allocation4], 16  }
   0xd   :  { %6544 = vsyncadd [#allocation4], 4294967280 }
   0xe   :  { %36 = sfence }
   0xf   :  { %v6595_v0 = vld [vmem:[%s7198_s3] sm:$0xff]  ;;  %vm66_vm0 = vcmask 64512   ;;  %v5550_v2 = vld [vmem:[%s7195_s0 + $0x8] sm:$0xff]   ;;  %v5551_v7 = vld [vmem:[%s7195_s0 + $0x10] sm:$0xff]   ;;  %v37_v45 = vlaneseq  ;;  %v6548_v51 = vmov 0.0   ;;  %vm755_vm2 = vcmask 89088  }
  0x10   :  { %v5535_v1 = vld [vmem:[%s7195_s0] sm:$0xff]   ;;  %v6604_v3 = vand.u32 4294901760, %v6595_v0  ;;  %v6610_v6 = vunpack.c.l.bf16 %v5550_v2  ;;  %v6615_v8 = vunpack.c.h.bf16 %v5550_v2  ;;  %v6617_v9 = vunpack.c.l.bf16 %v5551_v7  ;;  %s46_s10 = sld [smem:[#allocation2]]  ;;  %s5464_s11 = sld [smem:[#allocation2 + $0x1]] }
  0x11   :  { %v6606_v4 = vunpack.c.l.bf16 %v5535_v1  ;;  %v6608_v5 = vunpack.c.h.bf16 %v5535_v1  ;;  %v6619_v10 = vunpack.c.h.bf16 %v5551_v7  ;;  %v6749_v46 = vand.u32 127, %v37_v45  ;;  %v6774_v58 = vld [vmem:[%s7199_s4 + $0x20] sm:$0xff]  ;;  %s5465_s12 = sld [smem:[#allocation2 + $0x2]]  ;;  %s5490_s5 = sld [smem:[#allocation2 + $0x3]] }
  0x12   :  { %5787 = vmatprep.subr.mxu0 %v6604_v3  ;;  %v74_v13 = vsel %vm66_vm0, %v6610_v6, 0  ;;  %v213_v14 = vsub.f32 %v6595_v0, %v6604_v3  ;;  %v77_v18 = vsel %vm66_vm0, %v6615_v8, 0  ;;  %v80_v21 = vsel %vm66_vm0, %v6617_v9, 0  ;;  %s5491_s29 = sld [smem:[#allocation2 + $0x4]]  ;;  %s5492_s30 = sld [smem:[#allocation2 + $0x5]] }
  0x13   :  { %v68_v11 = vsel %vm66_vm0, %v6606_v4, 0  ;;  %v71_v12 = vsel %vm66_vm0, %v6608_v5, 0  ;;  %5788 = vmatpush3.msra.mxu0 %v6604_v3  ;;  %v6635_v17 = vsub.f32 %v74_v13, %v74_v13  ;;  %v6639_v19 = vsub.f32 %v77_v18, %v77_v18  ;;  %s5529_s15 = sld [smem:[#allocation2 + $0x7]]  ;;  %s5530_s16 = sld [smem:[#allocation2 + $0x8]] }
  0x14   :  { %v6631_v15 = vsub.f32 %v68_v11, %v68_v11  ;;  %v6633_v16 = vsub.f32 %v71_v12, %v71_v12  ;;  %v214_v20 = vand.u32 4294901760, %v213_v14  ;;  %v83_v22 = vsel %vm66_vm0, %v6619_v10, 0  ;;  %s6553_s17 = smov [#allocation5]  }
  0x15   :  { %v6652_v25 = vand.u32 4294901760, %v6635_v17  ;;  %v6654_v26 = vsub.f32 %v80_v21, %v80_v21  ;;  %v6657_v27 = vand.u32 4294901760, %v6639_v19  ;;  %v6659_v29 = vsub.f32 %v83_v22, %v83_v22  ;;  %s5454_s18 = sshll.u32 %s6553_s17, 4  ;;  %s5455_s18 = int_to_ptr.vmem [resolvable:$true] %s5454_s18 }
  0x16   :  { %v6646_v23 = vand.u32 4294901760, %v6631_v15  ;;  %v6649_v24 = vand.u32 4294901760, %v6633_v16  ;;  %v215_v28 = vsub.f32 %v213_v14, %v214_v20  ;;  %vm39_vm1 = vcmp.lt.s32.totalorder %v6749_v46, 3  ;;  %s6525_s19 = scalar_lea.vmem %s5455_s18, 32  ;;  %p6526_p6 = scmp.lt.s32.totalorder %s5455_s18, %s5455_s18 }
  0x17   :  { %v174_v32 = vsub.f32 %v6635_v17, %v6652_v25  ;;  %v6668_v33 = vand.u32 4294901760, %v6654_v26  ;;  %v184_v34 = vsub.f32 %v6639_v19, %v6657_v27  ;;  %v6673_v36 = vand.u32 4294901760, %v6659_v29 }
  0x18   :  { %v154_v30 = vsub.f32 %v6631_v15, %v6646_v23  ;;  %v164_v31 = vsub.f32 %v6633_v16, %v6649_v24  ;;  %v216_v35 = vand.u32 4294901760, %v215_v28  ;;  %v6756_v49 = vshrl.u32 %v37_v45, 7 }
  0x19   :  { %v6679_v39 = vand.u32 4294901760, %v174_v32  ;;  %v194_v40 = vsub.f32 %v6654_v26, %v6668_v33  ;;  %v6685_v41 = vand.u32 4294901760, %v184_v34  ;;  %v204_v42 = vsub.f32 %v6659_v29, %v6673_v36 }
  0x1a   :  { %v6675_v37 = vand.u32 4294901760, %v154_v30  ;;  %v6677_v38 = vand.u32 4294901760, %v164_v31  ;;  %5798 = vmatprep.subr.mxu0 %v216_v35  ;;  %v6761_v52 = vsel %vm39_vm1, 1.0, %v6548_v51  ;;  %v796_v56 = vsub.s32 0, %v6756_v49 }
  0x1b   :  { %v6690_v43 = vand.u32 4294901760, %v194_v40  ;;  %v6693_v44 = vand.u32 4294901760, %v204_v42  ;;  %v6549_v30 = vmov 0   ;;  %v765_v31 = vstv %s46_s10 }
  0x1c   :  { %5789 = vmatprep.mubr.f32.mxu0 %v6675_v37  ;;  %v797_v2 = vrot.slane %v6774_v58, %v796_v56  ;;  %6472 = vset.pattern.permute.xlu1 %v6549_v30  ;;  %v769_v32 = vstv %s5464_s11  ;;  %vm6551_vm3 = vmmov 0   ;;  %vm868_vm4 = vcmask 195584  }
  0x1d   :  { %5790 = vmatmul.mubr.f32.vlgmr.msra.gmra.mrb[0].mxu0 %v6677_v38  ;;  %6471 = vset.pattern.permute.xlu0 %v6549_v30  ;;  %vm1349_vm5 = vcmask 1042432   ;;  %v6552_v46 = vmov 1.0   ;;  %vm5446_vm6 = vcmask 57344  }
  0x1e   :  { %5792 = vmatprep.mubr.f32.mxu0 %v6679_v39  ;;  %5799 = vmatpush3.msra.mxu0 %v216_v35 }
  0x1f   :  { %5809 = vmatprep.subr.mxu0 %v213_v14  ;;  %5859 = vmatprep.mubr.msk.f32.mxu1 %vm6551_vm3, %v6548_v51 }
  0x21   :  { %5793 = vmatmul.mubr.f32.gmra.mrb[2].mxu0 %v6685_v41 }
  0x22   :  { %5795 = vmatprep.mubr.f32.mxu0 %v6690_v43 }
  0x25   :  { %5796 = vmatmul.mubr.f32.gmra.mrb[4].mxu0 %v6693_v44 }
  0x26   :  { %5800 = vmatprep.mubr.msk.f32.mxu0 %vm66_vm0, %v6606_v4 }
  0x29   :  { %5801 = vmatmul.mubr.msk.f32.vlgmr.msra.gmra.mrb[0].mxu0 %vm66_vm0, %v6608_v5 }
  0x2a   :  { %5803 = vmatprep.mubr.msk.f32.mxu0 %vm66_vm0, %v6610_v6  ;;  %5810 = vmatpush3.msra.mxu0 %v213_v14 }
  0x2b   :  { %5820 = vmatprep.subr.mxu0 %v6604_v3 }
  0x2d   :  { %5804 = vmatmul.mubr.msk.f32.gmra.mrb[2].mxu0 %vm66_vm0, %v6615_v8 }
  0x2e   :  { %5806 = vmatprep.mubr.msk.f32.mxu0 %vm66_vm0, %v6617_v9 }
  0x31   :  { %5807 = vmatmul.mubr.msk.f32.gmra.mrb[4].mxu0 %vm66_vm0, %v6619_v10 }
  0x32   :  { %5811 = vmatprep.mubr.f32.mxu0 %v6631_v15 }
  0x35   :  { %5812 = vmatmul.mubr.f32.vlgmr.msra.gmra.mrb[0].mxu0 %v6633_v16 }
  0x36   :  { %5814 = vmatprep.mubr.f32.mxu0 %v6635_v17  ;;  %5821 = vmatpush3.msra.mxu0 %v6604_v3 }
  0x37   :  { %5831 = vmatprep.subr.mxu0 %v214_v20 }
  0x39   :  { %5815 = vmatmul.mubr.f32.gmra.mrb[2].mxu0 %v6639_v19 }
  0x3a   :  { %5817 = vmatprep.mubr.f32.mxu0 %v6654_v26 }
  0x3d   :  { %5818 = vmatmul.mubr.f32.gmra.mrb[4].mxu0 %v6659_v29 }
  0x3e   :  { %5822 = vmatprep.mubr.f32.mxu0 %v6646_v23 }
  0x41   :  { %5823 = vmatmul.mubr.f32.vlgmr.msra.gmra.mrb[0].mxu0 %v6649_v24 }
  0x42   :  { %5825 = vmatprep.mubr.f32.mxu0 %v6652_v25  ;;  %5832 = vmatpush3.msra.mxu0 %v214_v20 }
  0x43   :  { %5842 = vmatprep.subr.mxu0 %v6604_v3 }
  0x45   :  { %5826 = vmatmul.mubr.f32.gmra.mrb[2].mxu0 %v6657_v27 }
  0x46   :  { %5828 = vmatprep.mubr.f32.mxu0 %v6668_v33 }
  0x49   :  { %5829 = vmatmul.mubr.f32.gmra.mrb[4].mxu0 %v6673_v36 }
  0x4a   :  { %5833 = vmatprep.mubr.msk.f32.mxu0 %vm66_vm0, %v6606_v4 }
  0x4d   :  { %5834 = vmatmul.mubr.msk.f32.vlgmr.msra.gmra.mrb[0].mxu0 %vm66_vm0, %v6608_v5 }
  0x4e   :  { %5836 = vmatprep.mubr.msk.f32.mxu0 %vm66_vm0, %v6610_v6  ;;  %5843 = vmatpush3.msra.mxu0 %v6604_v3 }
  0x51   :  { %5837 = vmatmul.mubr.msk.f32.gmra.mrb[2].mxu0 %vm66_vm0, %v6615_v8 }
  0x52   :  { %5839 = vmatprep.mubr.msk.f32.mxu0 %vm66_vm0, %v6617_v9 }
  0x55   :  { %5840 = vmatmul.mubr.msk.f32.gmra.mrb[4].mxu0 %vm66_vm0, %v6619_v10 }
  0x56   :  { %5844 = vmatprep.mubr.msk.f32.mxu0 %vm66_vm0, %v6606_v4 }
  0x59   :  { %5845 = vmatmul.mubr.msk.f32.vlgmr.msra.gmra.mrb[0].mxu0 %vm66_vm0, %v6608_v5 }
  0x5a   :  { %5847 = vmatprep.mubr.msk.f32.mxu0 %vm66_vm0, %v6610_v6 }
  0x5d   :  { %5848 = vmatmul.mubr.msk.f32.gmra.mrb[2].mxu0 %vm66_vm0, %v6615_v8 }
  0x5e   :  { %5850 = vmatprep.mubr.msk.f32.mxu0 %vm66_vm0, %v6617_v9 }
  0x61   :  { %5851 = vmatmul.mubr.msk.f32.gmra.mrb[4].mxu0 %vm66_vm0, %v6619_v10 }
  0x62   :  { %5974 = vmatprep.mubr.msk.f32.mxu0 %vm6551_vm3, %v6548_v51 }
 0x12c   :  { %v6751_v47 = vpop.f32.mrb[0].mxu0 }
 0x12d   :  { %v6753_v48 = vpop.f32.mrb[1].mxu0  ;;  %v799_v18 = vmul.f32 %v6751_v47, %v797_v2 }
 0x12e   :  { %v798_v13 = vmul.f32 %v797_v2, %v6753_v48 }
 0x12f   :  { %v804_v22 = vsel %vm755_vm2, %v799_v18, 0.0 }
 0x130   :  { %v5849_v50 = vpop.f32.mrb[2].mxu0  ;;  %v801_v20 = vsel %vm755_vm2, %v798_v13, 0.0 }
 0x131   :  { %v6764_v53 = vsub.f32 %v6753_v48, %v5849_v50  ;;  %v6766_v54 = vpop.f32.mrb[3].mxu0 }
 0x132   :  { %v800_v21 = vmul.f32 %v797_v2, %v6766_v54 }
 0x133   :  { %v749_v55 = vmul.f32 %v6761_v52, %v6764_v53 }
 0x134   :  { %v5852_v57 = vpop.f32.mrb[4].mxu0  ;;  %v807_v28 = vsel %vm755_vm2, %v800_v21, 0.0 }
 0x135   :  { %v6777_v59 = vsub.f32 %v6766_v54, %v5852_v57  ;;  %v736_v60 = vpop.f32.mrb[5].mxu0  ;;  %v752_v61 = vmul.f32 %v749_v55, %v6764_v53 }
 0x136   :  { %v6781_v62 = vsub.f32 %v6751_v47, %v736_v60 }
 0x137   :  { %v756_v63 = vsel %vm755_vm2, %v752_v61, 0.0  ;;  %v751_v1 = vmul.f32 %v6761_v52, %v6777_v59 }
 0x138   :  { %757 = vadd.xlane.f32.xlu0 %v756_v63  ;;  %v750_v3 = vmul.f32 %v6761_v52, %v6781_v62 }
 0x139   :  { %v754_v7 = vmul.f32 %v751_v1, %v6777_v59 }
 0x13a   :  { %v753_v11 = vmul.f32 %v750_v3, %v6781_v62 }
 0x13b   :  { %v762_v12 = vsel %vm755_vm2, %v754_v7, 0.0 }
 0x13c   :  { %763 = vadd.xlane.f32.xlu1 %v762_v12  ;;  %v759_v14 = vsel %vm755_vm2, %v753_v11, 0.0 }
 0x13d   :  { %760 = vadd.xlane.f32.xlu0 %v759_v14  ;;  %v6806_v14 = vld [vmem:[%s7197_s2] sm:$0xff] }
 0x140   :  { %802 = vadd.xlane.f32.xlu1 %v801_v20 }
 0x141   :  { %805 = vadd.xlane.f32.xlu0 %v804_v22 }
 0x144   :  { %808 = vadd.xlane.f32.xlu1 %v807_v28  ;;  %v813_v28 = vstv %s5465_s12 }
 0x1c5   :  { %v758_v34 = vpop.xlane.xlu0 %757 }
 0x1c6   :  { %v766_v35 = vmul.f32 %v765_v31, %v758_v34 }
 0x1c8   :  { %v770_v40 = vadd.f32 %v769_v32, %v766_v35 }
 0x1c9   :  { %v764_v42 = vpop.xlane.xlu1 %763 }
 0x1ca   :  { %v5484_v45 = vmul.f32 -1.442695, %v770_v40  ;;  %v768_v50 = vmul.f32 %v765_v31, %v764_v42  ;;  %v761_v55 = vpop.xlane.xlu0 %760 }
 0x1cb   :  { %v767_v57 = vmul.f32 %v765_v31, %v761_v55  ;;  %v6812_v31 = vld [vmem:[%s7197_s2 + $0x10] sm:$0xff] }
 0x1cc   :  { %6473 = vpow2.f32 %v5484_v45  ;;  %v772_v60 = vadd.f32 %v769_v32, %v768_v50 }
 0x1cd   :  { %v771_v61 = vadd.f32 %v769_v32, %v767_v57  ;;  %v803_v20 = vpop.xlane.xlu1 %802 }
 0x1ce   :  { %v5486_v63 = vmul.f32 -1.442695, %v772_v60  ;;  %v806_v60 = vpop.xlane.xlu0 %805 }
 0x1cf   :  { %v5485_v1 = vmul.f32 -1.442695, %v771_v61 }
 0x1d0   :  { %6475 = vpow2.f32 %v5486_v63 }
 0x1d1   :  { %6477 = vpow2.f32 %v5485_v1  ;;  %v809_v61 = vpop.xlane.xlu1 %808 }
 0x1d6   :  { %v6474_v2 = vpop.eup %6473 }
 0x1d7   :  { %v782_v3 = vadd.f32 1.0, %v6474_v2 }
 0x1d9   :  { %6479 = vrcp.f32 %v782_v3 }
 0x1da   :  { %v6476_v7 = vpop.eup %6475  ;;  %6481 = vrsqrt.f32 %v758_v34  ;;  %v6817_v34 = vld [vmem:[%s7197_s2 + $0x8] sm:$0xff]  ;;  %s6521_s2 = scalar_lea.vmem %s5455_s18, 16 }
 0x1db   :  { %v6478_v11 = vpop.eup %6477  ;;  %v784_v12 = vadd.f32 1.0, %v6476_v7  ;;  %p6522_p5 = scmp.ne.s32.totalorder %s5455_s18, %s6521_s2  ;;  %p6527_p7 = scmp.lt.s32.totalorder %s6525_s19, %s6521_s2 }
 0x1dc   :  { %v783_v13 = vadd.f32 1.0, %v6478_v11 }
 0x1dd   :  { %6483 = vrcp.f32 %v784_v12  ;;  %p6528_p8 = por %p6527_p7, %p6526_p6 }
 0x1de   :  { %6485 = vrcp.f32 %v783_v13 }
 0x1df   :  { %6487 = vrsqrt.f32 %v761_v55  ;;  %p6529_p9 = pnand %p6528_p8, %p6522_p5 }
 0x1e0   :  { %6489 = vrsqrt.f32 %v764_v42 }
 0x1e3   :  { %v6480_v18 = vpop.eup %6479 }
 0x1e4   :  { %v791_v21 = vmul.f32 %v6480_v18, %v6806_v14  ;;  %v6482_v22 = vpop.eup %6481 }
 0x1e5   :  { %v820_v42 = vmin.f32 %v6482_v22, 1e+08  ;;  %v866_v22 = vld [vmem:[%s7196_s1] sm:$0xf] }
 0x1e6   :  { %v810_v32 = vmul.f32 %v803_v20, %v791_v21  ;;  %846 = vperm.xlu1 %6472, %v791_v21   ;;  %v6550_v21 = vmov 0.0|0.0  }
 0x1e7   :  { %v6484_v35 = vpop.eup %6483  ;;  %6255 = vmatprep.subr.bf16.mxu1 %v6550_v21  ;;  %6300 = vmatprep.subr.bf16.mxu0 %v6550_v21 }
 0x1e8   :  { %v6486_v40 = vpop.eup %6485  ;;  %v814_v45 = vadd.f32 %v813_v28, %v810_v32  ;;  %v793_v50 = vmul.f32 %v6484_v35, %v6812_v31  ;;  %v6830_v32 = vunpack.c.l.bf16 %v866_v22 }
 0x1e9   :  { %v792_v55 = vmul.f32 %v6486_v40, %v6817_v34  ;;  %v6488_v57 = vpop.eup %6487 }
 0x1ea   :  { %v823_v63 = vmul.f32 %v820_v42, %v814_v45  ;;  %v812_v2 = vmul.f32 %v809_v61, %v793_v50  ;;  %v821_v3 = vmin.f32 %v6488_v57, 1e+08  ;;  %v6490_v11 = vpop.eup %6489 }
 0x1eb   :  { %v811_v1 = vmul.f32 %v806_v60, %v792_v55  ;;  %851 = vperm.xlu1 %6472, %v792_v55   ;;  %v822_v18 = vmin.f32 %v6490_v11, 1e+08 }
 0x1ec   :  { %828 = vperm.xlu0 %6471, %v823_v63   ;;  %v816_v12 = vadd.f32 %v813_v28, %v812_v2 }
 0x1ed   :  { %v815_v7 = vadd.f32 %v813_v28, %v811_v1 }
 0x1ee   :  { %v825_v20 = vmul.f32 %v822_v18, %v816_v12 }
 0x1ef   :  { %v824_v13 = vmul.f32 %v821_v3, %v815_v7 }
 0x1f1   :  { %833 = vperm.xlu1 %6472, %v824_v13  }
 0x1f5   :  { %838 = vperm.xlu1 %6472, %v825_v20  }
 0x1f9   :  { %856 = vperm.xlu1 %6472, %v793_v50   ;;  %v870_v50 = vsel %vm868_vm4, %v6830_v32, 0 }
 0x1fa   :  { %v6838_v60 = vsub.f32 %v870_v50, %v870_v50 }
 0x265   :  { %v847_v28 = vpop.permute.xlu1 %846 }
 0x266   :  { %v859_v40 = vmul.f32 %v847_v28, %v6753_v48 }
 0x26a   :  { %v852_v42 = vpop.permute.xlu1 %851 }
 0x26b   :  { %v829_v35 = vpop.permute.xlu0 %828  ;;  %v860_v63 = vmul.f32 %v6751_v47, %v852_v42 }
 0x26c   :  { %v841_v45 = vmul.f32 %v829_v35, %v6764_v53  ;;  %v6845_v53 = vand.u32 4294901760, %v6838_v60 }
 0x26e   :  { %v863_v55 = vsel %vm39_vm1, %v841_v45, %v859_v40  ;;  %v943_v18 = vsub.f32 %v6838_v60, %v6845_v53 }
 0x26f   :  { %v873_v57 = vand.u32 4294901760, %v863_v55 }
 0x270   :  { %v834_v61 = vpop.permute.xlu1 %833  ;;  %v6854_v50 = vand.u32 4294901760, %v943_v18  ;;  %v1347_v18 = vsel %vm755_vm2, %v6595_v0, 0 }
 0x271   :  { %v952_v1 = vsub.f32 %v863_v55, %v873_v57  ;;  %v842_v2 = vmul.f32 %v834_v61, %v6781_v62 }
 0x273   :  { %v864_v48 = vsel %vm39_vm1, %v842_v2, %v860_v63  ;;  %v953_v3 = vand.u32 4294901760, %v952_v1 }
 0x274   :  { %v876_v7 = vand.u32 4294901760, %v864_v48  ;;  %v839_v11 = vpop.permute.xlu1 %838 }
 0x275   :  { %v954_v47 = vsub.f32 %v952_v1, %v953_v3  ;;  %v843_v62 = vmul.f32 %v839_v11, %v6777_v59 }
 0x276   :  { %v959_v12 = vsub.f32 %v864_v48, %v876_v7  ;;  %v6256_v13 = vpack.c.bf16 %v876_v7, %v873_v57  ;;  %v50_v48 = vld [vmem:[%s7199_s4 + $0x8] sm:$0xff] }
 0x277   :  { %v955_v57 = vand.u32 4294901760, %v954_v47  ;;  %v1351_v7 = vsel %vm1349_vm5, %v50_v48, 0  ;;  %v51_v48 = vld [vmem:[%s7199_s4 + $0x10] sm:$0xff] }
 0x278   :  { %v960_v20 = vand.u32 4294901760, %v959_v12  ;;  %v857_v22 = vpop.permute.xlu1 %856  ;;  %6257 = vmatpush3.bf16.msra.mxu1 %v6256_v13  ;;  %v6262_v28 = vpack.c.bf16 %v959_v12, %v952_v1 }
 0x279   :  { %v861_v35 = vmul.f32 %v857_v22, %v6766_v54  ;;  %5857 = vmatprep.subr.mxu1 %v6548_v51 }
 0x27a   :  { %v961_v40 = vsub.f32 %v959_v12, %v960_v20  ;;  %v6268_v42 = vpack.c.bf16 %v960_v20, %v953_v3  ;;  %v49_v3 = vld [vmem:[%s7199_s4] sm:$0xff]  ;;  %v1357_v12 = vand.u32 4294901760, %v1351_v7  ;;  %v1420_v20 = vand.u32 4294901760, %v1347_v18 }
 0x27b   :  { %v865_v45 = vsel %vm39_vm1, %v843_v62, %v861_v35  ;;  %v1354_v11 = vand.u32 4294901760, %v49_v3 }
 0x27c   :  { %v879_v55 = vand.u32 4294901760, %v865_v45  ;;  %v962_v61 = vand.u32 4294901760, %v961_v40  ;;  %v1439_v47 = vsub.f32 %v1351_v7, %v1357_v12  ;;  %v1820_v7 = vand.u32 4294901760, %v51_v48 }
 0x27d   :  { %v1432_v22 = vsub.f32 %v49_v3, %v1354_v11 }
 0x27e   :  { %v966_v63 = vsub.f32 %v865_v45, %v879_v55  ;;  %5858 = vmatpush3.msra.mxu1 %v879_v55  ;;  %v6259_v2 = vpack.c.bf16 %v962_v61, %v955_v57  ;;  %v1440_v35 = vand.u32 4294901760, %v1439_v47  ;;  %v6274_v61 = vpack.c.bf16 %v1357_v12, %v1354_v11 }
 0x27f   :  { %5860 = vmatmul.mubr.f32.vlgmr.msra.gmra.mrb[0].mxu1 %v6854_v50  ;;  %6258 = vmatprep.subr.bf16.mxu1 %v6550_v21  ;;  %v1433_v62 = vand.u32 4294901760, %v1432_v22 }
 0x280   :  { %6260 = vmatpush3.bf16.msra.mxu1 %v6259_v2  ;;  %v967_v54 = vand.u32 4294901760, %v966_v63  ;;  %5868 = vmatprep.mubr.msk.f32.mxu1 %vm6551_vm3, %v6548_v51  ;;  %v1441_v45 = vsub.f32 %v1439_v47, %v1440_v35 }
 0x281   :  { %5866 = vmatprep.subr.mxu1 %v6548_v51 }
 0x282   :  { %v968_v59 = vsub.f32 %v966_v63, %v967_v54  ;;  %v1442_v2 = vand.u32 4294901760, %v1441_v45 }
 0x284   :  { %v969_v1 = vand.u32 4294901760, %v968_v59  ;;  %v6286_v59 = vpack.c.bf16 %v1440_v35, %v1433_v62 }
 0x286   :  { %5867 = vmatpush3.msra.mxu1 %v969_v1  ;;  %v52_v1 = vld [vmem:[%s7199_s4 + $0x18] sm:$0xff] }
 0x287   :  { %5869 = vmatmul.mubr.msk.f32.vlgmr.msra.gmra.mrb[0].mxu1 %vm868_vm4, %v6830_v32  ;;  %6261 = vmatprep.subr.bf16.mxu1 %v6550_v21  ;;  %v1817_v3 = vsel %vm1349_vm5, %v52_v1, 0 }
 0x288   :  { %6263 = vmatpush3.bf16.msra.mxu1 %v6262_v28  ;;  %5877 = vmatprep.mubr.msk.f32.mxu1 %vm6551_vm3, %v6548_v51  ;;  %v1421_v28 = vsub.f32 %v1347_v18, %v1420_v20  ;;  %v1823_v11 = vand.u32 4294901760, %v1817_v3  ;;  %v1898_v18 = vsub.f32 %v51_v48, %v1820_v7 }
 0x289   :  { %5875 = vmatprep.subr.mxu1 %v6548_v51 }
 0x28a   :  { %v1422_v40 = vand.u32 4294901760, %v1421_v28  ;;  %v6292_v12 = vpack.c.bf16 %v1823_v11, %v1820_v7 }
 0x28c   :  { %5876 = vmatpush3.msra.mxu1 %v966_v63  ;;  %v1423_v57 = vsub.f32 %v1421_v28, %v1422_v40  ;;  %6302 = vmatpush3.bf16.msra.mxu0 %v6292_v12 }
 0x28d   :  { %6264 = vmatprep.subr.bf16.mxu1 %v6550_v21  ;;  %6306 = vmatprep.subr.bf16.mxu0 %v6550_v21 }
 0x28f   :  { %5878 = vmatmul.mubr.f32.vlgmr.msra.gmra.mrb[0].mxu1 %v6838_v60 }
 0x290   :  { %6266 = vmatpush3.bf16.msra.mxu1 %v6256_v13  ;;  %5886 = vmatprep.mubr.msk.f32.mxu1 %vm6551_vm3, %v6548_v51 }
 0x291   :  { %5884 = vmatprep.subr.mxu1 %v6548_v51 }
 0x294   :  { %5885 = vmatpush3.msra.mxu1 %v879_v55 }
 0x295   :  { %6267 = vmatprep.subr.bf16.mxu1 %v6550_v21 }
 0x297   :  { %5887 = vmatmul.mubr.f32.vlgmr.msra.gmra.mrb[0].mxu1 %v6845_v53 }
 0x298   :  { %6269 = vmatpush3.bf16.msra.mxu1 %v6268_v42  ;;  %5895 = vmatprep.mubr.msk.f32.mxu1 %vm6551_vm3, %v6548_v51  ;;  %v1434_v42 = vsub.f32 %v1432_v22, %v1433_v62 }
 0x299   :  { %5893 = vmatprep.subr.mxu1 %v6548_v51 }
 0x29a   :  { %v1435_v63 = vand.u32 4294901760, %v1434_v42 }
 0x29c   :  { %5894 = vmatpush3.msra.mxu1 %v967_v54  ;;  %v1424_v54 = vand.u32 4294901760, %v1423_v57 }
 0x29d   :  { %6270 = vmatprep.subr.bf16.mxu1 %v6550_v21 }
 0x29f   :  { %5896 = vmatmul.mubr.msk.f32.vlgmr.msra.gmra.mrb[0].mxu1 %vm868_vm4, %v6830_v32 }
 0x2a0   :  { %6272 = vmatpush3.bf16.msra.mxu1 %v6256_v13  ;;  %5904 = vmatprep.mubr.msk.f32.mxu1 %vm6551_vm3, %v6548_v51  ;;  %v6277_v13 = vpack.c.bf16 %v1442_v2, %v1435_v63 }
 0x2a1   :  { %5902 = vmatprep.subr.mxu1 %v6548_v51 }
 0x2a4   :  { %5903 = vmatpush3.msra.mxu1 %v879_v55  ;;  %v6280_v55 = vpack.c.bf16 %v1439_v47, %v1432_v22  ;;  %v1905_v22 = vsub.f32 %v1817_v3, %v1823_v11 }
 0x2a5   :  { %6273 = vmatprep.subr.bf16.mxu1 %v6550_v21 }
 0x2a6   :  { %v1906_v47 = vand.u32 4294901760, %v1905_v22  ;;  %v6298_v45 = vpack.c.bf16 %v1905_v22, %v1898_v18 }
 0x2a7   :  { %5905 = vmatmul.mubr.msk.f32.vlgmr.msra.gmra.mrb[0].mxu1 %vm868_vm4, %v6830_v32 }
 0x2a8   :  { %6275 = vmatpush3.bf16.msra.mxu1 %v6274_v61  ;;  %5911 = vmatprep.mubr.msk.f32.mxu1 %vm6551_vm3, %v6548_v51  ;;  %v1907_v62 = vsub.f32 %v1905_v22, %v1906_v47 }
 0x2a9   :  { %6276 = vmatprep.subr.bf16.mxu1 %v6550_v21 }
 0x2ab   :  { %5912 = vmatmul.mubr.f32.vlgmr.msra.gmra.mrb[2].mxu1 %v1424_v54 }
 0x2ac   :  { %6278 = vmatpush3.bf16.msra.mxu1 %v6277_v13  ;;  %5918 = vmatprep.mubr.msk.f32.mxu1 %vm6551_vm3, %v6548_v51 }
 0x2ad   :  { %6279 = vmatprep.subr.bf16.mxu1 %v6550_v21 }
 0x2af   :  { %5919 = vmatmul.mubr.f32.vlgmr.msra.gmra.mrb[4].mxu1 %v1420_v20 }
 0x2b0   :  { %6281 = vmatpush3.bf16.msra.mxu1 %v6280_v55  ;;  %5925 = vmatprep.mubr.msk.f32.mxu1 %vm6551_vm3, %v6548_v51 }
 0x2b1   :  { %6282 = vmatprep.subr.bf16.mxu1 %v6550_v21 }
 0x2b3   :  { %5926 = vmatmul.mubr.f32.vlgmr.msra.gmra.mrb[6].mxu1 %v1421_v28 }
 0x2b4   :  { %6284 = vmatpush3.bf16.msra.mxu1 %v6274_v61  ;;  %5932 = vmatprep.mubr.msk.f32.mxu1 %vm6551_vm3, %v6548_v51 }
 0x2b5   :  { %6285 = vmatprep.subr.bf16.mxu1 %v6550_v21 }
 0x2b7   :  { %5933 = vmatmul.mubr.f32.vlgmr.msra.gmra.mrb[8].mxu1 %v1422_v40  ;;  %v1908_v40 = vand.u32 4294901760, %v1907_v62 }
 0x2b8   :  { %6287 = vmatpush3.bf16.msra.mxu1 %v6286_v59  ;;  %5939 = vmatprep.mubr.msk.f32.mxu1 %vm6551_vm3, %v6548_v51 }
 0x2b9   :  { %6288 = vmatprep.subr.bf16.mxu1 %v6550_v21 }
 0x2bb   :  { %5940 = vmatmul.mubr.f32.vlgmr.msra.gmra.mrb[10].mxu1 %v1420_v20 }
 0x2bc   :  { %6290 = vmatpush3.bf16.msra.mxu1 %v6274_v61  ;;  %5946 = vmatprep.mubr.msk.f32.mxu1 %vm6551_vm3, %v6548_v51 }
 0x2bd   :  { %6291 = vmatprep.subr.bf16.mxu1 %v6550_v21 }
 0x2bf   :  { %5947 = vmatmul.mubr.f32.vlgmr.msra.gmra.mrb[12].mxu1 %v1420_v20  ;;  %v1899_v20 = vand.u32 4294901760, %v1898_v18 }
 0x2c0   :  { %5953 = vmatprep.mubr.msk.f32.mxu1 %vm6551_vm3, %v6548_v51  ;;  %6293 = vmatpush3.bf16.msra.mxu1 %v6292_v12 }
 0x2c1   :  { %6294 = vmatprep.subr.bf16.mxu1 %v6550_v21  ;;  %v1900_v28 = vsub.f32 %v1898_v18, %v1899_v20  ;;  %v6304_v57 = vpack.c.bf16 %v1906_v47, %v1899_v20 }
 0x2c3   :  { %v1901_v35 = vand.u32 4294901760, %v1900_v28 }
 0x2c5   :  { %v6295_v42 = vpack.c.bf16 %v1908_v40, %v1901_v35 }
 0x37a   :  { %v1340_v61 = vpop.f32.mrb[0].mxu1 }
 0x37b   :  { %v1814_v63 = vsel %vm755_vm2, %v1340_v61, 0  ;;  %v5906_v2 = vpop.f32.mrb[1].mxu1  ;;  %v1344_v40 = vadd.f32 %v1340_v61, %v6595_v0 }
 0x37c   :  { %v1886_v54 = vand.u32 4294901760, %v1814_v63 }
 0x37e   :  { %v1887_v13 = vsub.f32 %v1814_v63, %v1886_v54  ;;  %v1426_v55 = vpop.f32.mrb[2].mxu1 }
 0x37f   :  { %v5913_v59 = vpop.f32.mrb[3].mxu1 }
 0x380   :  { %v1888_v1 = vand.u32 4294901760, %v1887_v13 }
 0x382   :  { %v1889_v48 = vsub.f32 %v1887_v13, %v1888_v1  ;;  %5975 = vmatmul.mubr.f32.vlgmr.msra.gmra.mrb[6].mxu0 %v1888_v1  ;;  %v1507_v3 = vpop.f32.mrb[4].mxu1 }
 0x383   :  { %6308 = vmatpush3.bf16.msra.mxu0 %v6292_v12  ;;  %5988 = vmatprep.mubr.msk.f32.mxu0 %vm6551_vm3, %v6548_v51  ;;  %v1508_v7 = vadd.f32 %v1507_v3, %v1426_v55  ;;  %v5920_v11 = vpop.f32.mrb[5].mxu1 }
 0x384   :  { %v1890_v18 = vand.u32 4294901760, %v1889_v48  ;;  %6309 = vmatprep.subr.bf16.mxu0 %v6550_v21 }
 0x386   :  { %5954 = vmatmul.mubr.f32.vlgmr.msra.gmra.mrb[14].mxu1 %v1890_v18  ;;  %5989 = vmatmul.mubr.f32.vlgmr.msra.gmra.mrb[8].mxu0 %v1886_v54  ;;  %v1583_v22 = vpop.f32.mrb[6].mxu1 }
 0x387   :  { %6296 = vmatpush3.bf16.msra.mxu1 %v6295_v42  ;;  %5960 = vmatprep.mubr.msk.f32.mxu1 %vm6551_vm3, %v6548_v51  ;;  %v1584_v20 = vadd.f32 %v1583_v22, %v1508_v7  ;;  %v5927_v47 = vpop.f32.mrb[7].mxu1 }
 0x388   :  { %6297 = vmatprep.subr.bf16.mxu1 %v6550_v21  ;;  %6063 = vmatprep.mubr.msk.f32.mxu0 %vm6551_vm3, %v6548_v51 }
 0x38a   :  { %5961 = vmatmul.mubr.f32.vlgmr.msra.gmra.mrb[16].mxu1 %v1886_v54  ;;  %v1658_v12 = vpop.f32.mrb[8].mxu1 }
 0x38b   :  { %6299 = vmatpush3.bf16.msra.mxu1 %v6298_v45  ;;  %5967 = vmatprep.mubr.msk.f32.mxu1 %vm6551_vm3, %v6548_v51  ;;  %v1659_v28 = vadd.f32 %v1658_v12, %v1584_v20  ;;  %v5934_v62 = vpop.f32.mrb[9].mxu1  ;;  %v1345_v45 = vmul.f32 %v6761_v52, %v1344_v40  ;;  %v2281_v12 = vsub.s32 1, %v6756_v49  ;;  %v4995_v49 = vsel %vm755_vm2, 1.0, %v6549_v30 }
 0x38c   :  { %6303 = vmatprep.subr.bf16.mxu1 %v6550_v21 }
 0x38d   :  { %v2282_v40 = vrot.slane %v6774_v58, %v2281_v12 }
 0x38e   :  { %5968 = vmatmul.mubr.f32.vlgmr.msra.gmra.mrb[18].mxu1 %v1887_v13  ;;  %v1735_v35 = vpop.f32.mrb[10].mxu1 }
 0x38f   :  { %6305 = vmatpush3.bf16.msra.mxu1 %v6304_v57  ;;  %v1736_v42 = vadd.f32 %v1735_v35, %v1659_v28  ;;  %v5941_v63 = vpop.f32.mrb[11].mxu1  ;;  %5981 = vmatprep.mubr.msk.f32.mxu1 %vm6551_vm3, %v6548_v51 }
 0x392   :  { %v1808_v2 = vpop.f32.mrb[12].mxu1  ;;  %5982 = vmatmul.mubr.f32.vlgmr.msra.gmra.mrb[20].mxu1 %v1886_v54 }
 0x393   :  { %v1809_v55 = vadd.f32 %v1808_v2, %v1736_v42  ;;  %v5948_v59 = vpop.f32.mrb[13].mxu1  ;;  %5993 = vmatprep.mubr.f32.mxu1 %v6675_v37 }
 0x395   :  { %v1812_v1 = vadd.f32 %v1809_v55, %v1345_v45 }
 0x455   :  { %v2124_v48 = vpop.f32.mrb[6].mxu0 }
 0x456   :  { %v5976_v13 = vpop.f32.mrb[7].mxu0 }
 0x457   :  { %v2972_v13 = vstv %s5490_s5 }
 0x459   :  { %v1892_v3 = vpop.f32.mrb[14].mxu1  ;;  %v2274_v7 = vpop.f32.mrb[8].mxu0 }
 0x45a   :  { %v5955_v0 = vpop.f32.mrb[15].mxu1  ;;  %v5990_v57 = vpop.f32.mrb[9].mxu0 }
 0x45d   :  { %v1973_v61 = vpop.f32.mrb[16].mxu1 }
 0x45e   :  { %v1974_v11 = vadd.f32 %v1973_v61, %v1892_v3  ;;  %v5962_v18 = vpop.f32.mrb[17].mxu1  ;;  %v2976_v3 = vstv %s5491_s29 }
 0x461   :  { %v2049_v22 = vpop.f32.mrb[18].mxu1 }
 0x462   :  { %v2050_v20 = vadd.f32 %v2049_v22, %v1974_v11  ;;  %v5969_v47 = vpop.f32.mrb[19].mxu1 }
 0x464   :  { %v2125_v54 = vadd.f32 %v2124_v48, %v2050_v20 }
 0x465   :  { %v2201_v28 = vpop.f32.mrb[20].mxu1 }
 0x466   :  { %v2202_v62 = vadd.f32 %v2201_v28, %v2125_v54  ;;  %v5983_v35 = vpop.f32.mrb[21].mxu1 }
 0x468   :  { %v2275_v37 = vadd.f32 %v2274_v7, %v2202_v62 }
 0x46a   :  { %v2278_v42 = vadd.f32 %v2275_v37, %v1812_v1 }
 0x46c   :  { %v6945_v63 = vadd.f32 %v2282_v40, %v2278_v42 }
 0x46e   :  { %v2294_v2 = vand.u32 4294901760, %v6945_v63 }
 0x470   :  { %5991 = vmatprep.subr.mxu1 %v2294_v2  ;;  %v2421_v45 = vsub.f32 %v6945_v63, %v2294_v2 }
 0x471   :  { %5992 = vmatpush3.msra.mxu1 %v2294_v2 }
 0x472   :  { %5994 = vmatmul.mubr.f32.vlgmr.msra.gmra.mrb[22].mxu1 %v6677_v38  ;;  %v2422_v55 = vand.u32 4294901760, %v2421_v45 }
 0x473   :  { %5996 = vmatprep.mubr.f32.mxu1 %v6679_v39 }
 0x474   :  { %v2423_v59 = vsub.f32 %v2421_v45, %v2422_v55 }
 0x476   :  { %5997 = vmatmul.mubr.f32.gmra.mrb[24].mxu1 %v6685_v41  ;;  %v2424_v48 = vand.u32 4294901760, %v2423_v59 }
 0x477   :  { %5999 = vmatprep.mubr.f32.mxu1 %v6690_v43 }
 0x478   :  { %6002 = vmatprep.subr.mxu1 %v2424_v48 }
 0x479   :  { %6003 = vmatpush3.msra.mxu1 %v2424_v48 }
 0x47a   :  { %6000 = vmatmul.mubr.f32.gmra.mrb[26].mxu1 %v6693_v44  ;;  %6013 = vmatprep.subr.mxu1 %v2421_v45 }
 0x47b   :  { %6004 = vmatprep.mubr.msk.f32.mxu1 %vm66_vm0, %v6606_v4 }
 0x47e   :  { %6005 = vmatmul.mubr.msk.f32.vlgmr.msra.gmra.mrb[22].mxu1 %vm66_vm0, %v6608_v5 }
 0x47f   :  { %6014 = vmatpush3.msra.mxu1 %v2421_v45  ;;  %6007 = vmatprep.mubr.msk.f32.mxu1 %vm66_vm0, %v6610_v6 }
 0x480   :  { %6024 = vmatprep.subr.mxu1 %v2294_v2 }
 0x482   :  { %6008 = vmatmul.mubr.msk.f32.gmra.mrb[24].mxu1 %vm66_vm0, %v6615_v8 }
 0x483   :  { %6010 = vmatprep.mubr.msk.f32.mxu1 %vm66_vm0, %v6617_v9 }
 0x486   :  { %6011 = vmatmul.mubr.msk.f32.gmra.mrb[26].mxu1 %vm66_vm0, %v6619_v10 }
 0x487   :  { %6015 = vmatprep.mubr.f32.mxu1 %v6631_v15 }
 0x48a   :  { %6016 = vmatmul.mubr.f32.vlgmr.msra.gmra.mrb[22].mxu1 %v6633_v16 }
 0x48b   :  { %6025 = vmatpush3.msra.mxu1 %v2294_v2  ;;  %6018 = vmatprep.mubr.f32.mxu1 %v6635_v17 }
 0x48c   :  { %6035 = vmatprep.subr.mxu1 %v2422_v55 }
 0x48e   :  { %6019 = vmatmul.mubr.f32.gmra.mrb[24].mxu1 %v6639_v19 }
 0x48f   :  { %6021 = vmatprep.mubr.f32.mxu1 %v6654_v26 }
 0x492   :  { %6022 = vmatmul.mubr.f32.gmra.mrb[26].mxu1 %v6659_v29 }
 0x493   :  { %6026 = vmatprep.mubr.f32.mxu1 %v6646_v23 }
 0x496   :  { %6027 = vmatmul.mubr.f32.vlgmr.msra.gmra.mrb[22].mxu1 %v6649_v24 }
 0x497   :  { %6036 = vmatpush3.msra.mxu1 %v2422_v55  ;;  %6029 = vmatprep.mubr.f32.mxu1 %v6652_v25 }
 0x498   :  { %6046 = vmatprep.subr.mxu1 %v2294_v2 }
 0x49a   :  { %6030 = vmatmul.mubr.f32.gmra.mrb[24].mxu1 %v6657_v27 }
 0x49b   :  { %6032 = vmatprep.mubr.f32.mxu1 %v6668_v33 }
 0x49e   :  { %6033 = vmatmul.mubr.f32.gmra.mrb[26].mxu1 %v6673_v36 }
 0x49f   :  { %6037 = vmatprep.mubr.msk.f32.mxu1 %vm66_vm0, %v6606_v4 }
 0x4a2   :  { %6038 = vmatmul.mubr.msk.f32.vlgmr.msra.gmra.mrb[22].mxu1 %vm66_vm0, %v6608_v5 }
 0x4a3   :  { %6047 = vmatpush3.msra.mxu1 %v2294_v2  ;;  %6040 = vmatprep.mubr.msk.f32.mxu1 %vm66_vm0, %v6610_v6 }
 0x4a4   :  { %6354 = vmatprep.subr.bf16.mxu1 %v6550_v21 }
 0x4a6   :  { %6041 = vmatmul.mubr.msk.f32.gmra.mrb[24].mxu1 %vm66_vm0, %v6615_v8 }
 0x4a7   :  { %6043 = vmatprep.mubr.msk.f32.mxu1 %vm66_vm0, %v6617_v9 }
 0x4aa   :  { %6044 = vmatmul.mubr.msk.f32.gmra.mrb[26].mxu1 %vm66_vm0, %v6619_v10 }
 0x4ab   :  { %6048 = vmatprep.mubr.msk.f32.mxu1 %vm66_vm0, %v6606_v4 }
 0x4ae   :  { %6049 = vmatmul.mubr.msk.f32.vlgmr.msra.gmra.mrb[22].mxu1 %vm66_vm0, %v6608_v5 }
 0x4af   :  { %6051 = vmatprep.mubr.msk.f32.mxu1 %vm66_vm0, %v6610_v6 }
 0x4b2   :  { %6052 = vmatmul.mubr.msk.f32.gmra.mrb[24].mxu1 %vm66_vm0, %v6615_v8 }
 0x4b3   :  { %6054 = vmatprep.mubr.msk.f32.mxu1 %vm66_vm0, %v6617_v9 }
 0x4b6   :  { %6055 = vmatmul.mubr.msk.f32.gmra.mrb[26].mxu1 %vm66_vm0, %v6619_v10  ;;  %v7019_v10 = vld [vmem:[%s7199_s4 + $0x48] sm:$0xff] }
 0x4b7   :  { %6178 = vmatprep.mubr.msk.f32.mxu1 %vm6551_vm3, %v6548_v51  ;;  %v3004_v27 = vrot.slane %v7019_v10, %v796_v56 }
 0x581   :  { %v7005_v15 = vpop.f32.mrb[22].mxu1 }
 0x582   :  { %v7007_v4 = vpop.f32.mrb[23].mxu1  ;;  %v3006_v43 = vmul.f32 %v7005_v15, %v3004_v27 }
 0x583   :  { %v3005_v39 = vmul.f32 %v3004_v27, %v7007_v4 }
 0x584   :  { %v3011_v58 = vsel %vm755_vm2, %v3006_v43, 0.0 }
 0x585   :  { %v6053_v5 = vpop.f32.mrb[24].mxu1  ;;  %v3008_v44 = vsel %vm755_vm2, %v3005_v39, 0.0 }
 0x586   :  { %v7010_v16 = vsub.f32 %v7007_v4, %v6053_v5  ;;  %v7012_v6 = vpop.f32.mrb[25].mxu1  ;;  %v3020_v5 = vstv %s5492_s30 }
 0x587   :  { %v3007_v56 = vmul.f32 %v3004_v27, %v7012_v6 }
 0x588   :  { %v2957_v8 = vmul.f32 %v6761_v52, %v7010_v16 }
 0x589   :  { %v6056_v9 = vpop.f32.mrb[26].mxu1  ;;  %v3014_v1 = vsel %vm755_vm2, %v3007_v56, 0.0 }
 0x58a   :  { %v7022_v17 = vsub.f32 %v7012_v6, %v6056_v9  ;;  %v2944_v19 = vpop.f32.mrb[27].mxu1  ;;  %v2960_v23 = vmul.f32 %v2957_v8, %v7010_v16 }
 0x58b   :  { %v7026_v24 = vsub.f32 %v7005_v15, %v2944_v19 }
 0x58c   :  { %v2963_v25 = vsel %vm755_vm2, %v2960_v23, 0.0  ;;  %v2959_v26 = vmul.f32 %v6761_v52, %v7022_v17 }
 0x58d   :  { %2964 = vadd.xlane.f32.xlu1 %v2963_v25  ;;  %v2958_v29 = vmul.f32 %v6761_v52, %v7026_v24 }
 0x58e   :  { %v2962_v33 = vmul.f32 %v2959_v26, %v7022_v17 }
 0x58f   :  { %v2961_v36 = vmul.f32 %v2958_v29, %v7026_v24 }
 0x590   :  { %v2969_v38 = vsel %vm755_vm2, %v2962_v33, 0.0 }
 0x591   :  { %2970 = vadd.xlane.f32.xlu1 %v2969_v38  ;;  %v2966_v41 = vsel %vm755_vm2, %v2961_v36, 0.0 }
 0x592   :  { %2967 = vadd.xlane.f32.xlu0 %v2966_v41 }
 0x595   :  { %3009 = vadd.xlane.f32.xlu1 %v3008_v44 }
 0x596   :  { %3012 = vadd.xlane.f32.xlu0 %v3011_v58 }
 0x599   :  { %3015 = vadd.xlane.f32.xlu1 %v3014_v1 }
 0x61a   :  { %v2965_v7 = vpop.xlane.xlu1 %2964 }
 0x61b   :  { %v2973_v0 = vmul.f32 %v2972_v13, %v2965_v7 }
 0x61d   :  { %v2977_v57 = vadd.f32 %v2976_v3, %v2973_v0 }
 0x61e   :  { %v2971_v61 = vpop.xlane.xlu1 %2970 }
 0x61f   :  { %v5516_v11 = vmul.f32 -1.442695, %v2977_v57  ;;  %v2975_v18 = vmul.f32 %v2972_v13, %v2971_v61  ;;  %v2968_v22 = vpop.xlane.xlu0 %2967 }
 0x620   :  { %v2974_v20 = vmul.f32 %v2972_v13, %v2968_v22 }
 0x621   :  { %6491 = vpow2.f32 %v5516_v11  ;;  %v2979_v47 = vadd.f32 %v2976_v3, %v2975_v18 }
 0x622   :  { %v2978_v54 = vadd.f32 %v2976_v3, %v2974_v20  ;;  %v3010_v8 = vpop.xlane.xlu1 %3009 }
 0x623   :  { %v5518_v28 = vmul.f32 -1.442695, %v2979_v47  ;;  %v3013_v33 = vpop.xlane.xlu0 %3012 }
 0x624   :  { %v5517_v62 = vmul.f32 -1.442695, %v2978_v54 }
 0x625   :  { %6493 = vpow2.f32 %v5518_v28 }
 0x626   :  { %6495 = vpow2.f32 %v5517_v62  ;;  %v3016_v43 = vpop.xlane.xlu1 %3015 }
 0x62b   :  { %v6492_v35 = vpop.eup %6491 }
 0x62c   :  { %v2989_v37 = vadd.f32 1.0, %v6492_v35 }
 0x62e   :  { %6497 = vrcp.f32 %v2989_v37 }
 0x62f   :  { %v6494_v40 = vpop.eup %6493  ;;  %6499 = vrsqrt.f32 %v2965_v7 }
 0x630   :  { %v6496_v42 = vpop.eup %6495  ;;  %v2991_v2 = vadd.f32 1.0, %v6494_v40 }
 0x631   :  { %v2990_v45 = vadd.f32 1.0, %v6496_v42 }
 0x632   :  { %6501 = vrcp.f32 %v2991_v2 }
 0x633   :  { %6503 = vrcp.f32 %v2990_v45 }
 0x634   :  { %6505 = vrsqrt.f32 %v2968_v22 }
 0x635   :  { %6507 = vrsqrt.f32 %v2971_v61 }
 0x638   :  { %v6498_v55 = vpop.eup %6497 }
 0x639   :  { %v2998_v59 = vmul.f32 %v6498_v55, %v6806_v14  ;;  %v6500_v48 = vpop.eup %6499 }
 0x63a   :  { %v3027_v25 = vmin.f32 %v6500_v48, 1e+08 }
 0x63b   :  { %v3017_v9 = vmul.f32 %v3010_v8, %v2998_v59 }
 0x63c   :  { %v6502_v19 = vpop.eup %6501 }
 0x63d   :  { %v6504_v23 = vpop.eup %6503  ;;  %v3021_v26 = vadd.f32 %v3020_v5, %v3017_v9  ;;  %v3000_v39 = vmul.f32 %v6502_v19, %v6812_v31 }
 0x63e   :  { %v2999_v27 = vmul.f32 %v6504_v23, %v6817_v34  ;;  %v6506_v29 = vpop.eup %6505 }
 0x63f   :  { %v3030_v36 = vmul.f32 %v3027_v25, %v3021_v26  ;;  %v3028_v41 = vmin.f32 %v6506_v29, 1e+08  ;;  %v3019_v44 = vmul.f32 %v3016_v43, %v3000_v39  ;;  %v6508_v58 = vpop.eup %6507  ;;  %v5493_v25 = vld [vmem:[%s7199_s4 + $0x28] sm:$0xff] }
 0x640   :  { %v3018_v38 = vmul.f32 %v3013_v33, %v2999_v27  ;;  %v3029_v13 = vmin.f32 %v6508_v58, 1e+08 }
 0x641   :  { %3035 = vperm.xlu0 %6471, %v3030_v36   ;;  %v3023_v1 = vadd.f32 %v3020_v5, %v3019_v44 }
 0x642   :  { %v3022_v14 = vadd.f32 %v3020_v5, %v3018_v38 }
 0x643   :  { %v3032_v34 = vmul.f32 %v3029_v13, %v3023_v1 }
 0x644   :  { %v3031_v56 = vmul.f32 %v3028_v41, %v3022_v14 }
 0x645   :  { %3058 = vperm.xlu0 %6471, %v2999_v27   ;;  %v3553_v27 = vand.u32 4294901760, %v5493_v25 }
 0x646   :  { %3040 = vperm.xlu1 %6472, %v3031_v56  }
 0x647   :  { %v3631_v33 = vsub.f32 %v5493_v25, %v3553_v27 }
 0x649   :  { %3063 = vperm.xlu0 %6471, %v3000_v39   ;;  %v3632_v39 = vand.u32 4294901760, %v3631_v33 }
 0x64a   :  { %3053 = vperm.xlu1 %6472, %v2998_v59  }
 0x64e   :  { %3045 = vperm.xlu1 %6472, %v3032_v34  }
 0x6c0   :  { %v3036_v3 = vpop.permute.xlu0 %3035 }
 0x6c1   :  { %v3048_v22 = vmul.f32 %v3036_v3, %v7010_v16 }
 0x6c4   :  { %v3059_v7 = vpop.permute.xlu0 %3058 }
 0x6c5   :  { %v3067_v0 = vmul.f32 %v7005_v15, %v3059_v7  ;;  %v3041_v31 = vpop.permute.xlu1 %3040 }
 0x6c6   :  { %v3049_v57 = vmul.f32 %v3041_v31, %v7026_v24  ;;  %v5495_v31 = vld [vmem:[%s7199_s4 + $0x38] sm:$0xff] }
 0x6c8   :  { %v3070_v61 = vsel %vm39_vm1, %v3049_v57, %v3067_v0  ;;  %v3064_v54 = vpop.permute.xlu0 %3063  ;;  %v5496_v0 = vld [vmem:[%s7199_s4 + $0x40] sm:$0xff] }
 0x6c9   :  { %v3076_v11 = vand.u32 4294901760, %v3070_v61  ;;  %v3054_v18 = vpop.permute.xlu1 %3053  ;;  %v3068_v37 = vmul.f32 %v3064_v54, %v7012_v6  ;;  %v4016_v57 = vsel %vm1349_vm5, %v5496_v0, 0 }
 0x6ca   :  { %v3066_v20 = vmul.f32 %v3054_v18, %v7007_v4 }
 0x6cb   :  { %v3159_v47 = vsub.f32 %v3070_v61, %v3076_v11  ;;  %v4019_v61 = vand.u32 4294901760, %v5495_v31 }
 0x6cc   :  { %v3069_v28 = vsel %vm39_vm1, %v3048_v22, %v3066_v20 }
 0x6cd   :  { %v3160_v62 = vand.u32 4294901760, %v3159_v47  ;;  %v3073_v35 = vand.u32 4294901760, %v3069_v28  ;;  %v3046_v15 = vpop.permute.xlu1 %3045  ;;  %v4097_v22 = vsub.f32 %v5495_v31, %v4019_v61 }
 0x6ce   :  { %v3050_v24 = vmul.f32 %v3046_v15, %v7022_v17 }
 0x6cf   :  { %v3152_v40 = vsub.f32 %v3069_v28, %v3073_v35  ;;  %v6310_v42 = vpack.c.bf16 %v3076_v11, %v3073_v35  ;;  %v3161_v4 = vsub.f32 %v3159_v47, %v3160_v62  ;;  %v4022_v11 = vand.u32 4294901760, %v4016_v57 }
 0x6d0   :  { %v3071_v2 = vsel %vm39_vm1, %v3050_v24, %v3068_v37 }
 0x6d1   :  { %v3153_v16 = vand.u32 4294901760, %v3152_v40  ;;  %v3079_v45 = vand.u32 4294901760, %v3071_v2  ;;  %6311 = vmatpush3.bf16.msra.mxu0 %v6310_v42  ;;  %v6316_v55 = vpack.c.bf16 %v3159_v47, %v3152_v40  ;;  %v3162_v6 = vand.u32 4294901760, %v3161_v4 }
 0x6d2   :  { %6061 = vmatprep.subr.mxu0 %v6548_v51  ;;  %v6346_v18 = vpack.c.bf16 %v4022_v11, %v4019_v61  ;;  %v4104_v20 = vsub.f32 %v4016_v57, %v4022_v11  ;;  %v4098_v47 = vand.u32 4294901760, %v4097_v22 }
 0x6d3   :  { %v3166_v59 = vsub.f32 %v3071_v2, %v3079_v45  ;;  %v3154_v48 = vsub.f32 %v3152_v40, %v3153_v16  ;;  %v6322_v5 = vpack.c.bf16 %v3160_v62, %v3153_v16 }
 0x6d4   :  { %6356 = vmatpush3.bf16.msra.mxu1 %v6346_v18  ;;  %v4105_v54 = vand.u32 4294901760, %v4104_v20  ;;  %v4099_v28 = vsub.f32 %v4097_v22, %v4098_v47  ;;  %v6352_v24 = vpack.c.bf16 %v4104_v20, %v4097_v22 }
 0x6d5   :  { %6062 = vmatpush3.msra.mxu0 %v3079_v45  ;;  %v3155_v8 = vand.u32 4294901760, %v3154_v48  ;;  %v3167_v9 = vand.u32 4294901760, %v3166_v59  ;;  %6360 = vmatprep.subr.bf16.mxu1 %v6550_v21 }
 0x6d6   :  { %6064 = vmatmul.mubr.f32.vlgmr.msra.gmra.mrb[10].mxu0 %v6854_v50  ;;  %6312 = vmatprep.subr.bf16.mxu0 %v6550_v21  ;;  %v5494_v50 = vld [vmem:[%s7199_s4 + $0x30] sm:$0xff]  ;;  %v4106_v62 = vsub.f32 %v4104_v20, %v4105_v54  ;;  %v4100_v35 = vand.u32 4294901760, %v4099_v28  ;;  %v6358_v40 = vpack.c.bf16 %v4105_v54, %v4098_v47 }
 0x6d7   :  { %v6313_v17 = vpack.c.bf16 %v3162_v6, %v3155_v8  ;;  %v3168_v19 = vsub.f32 %v3166_v59, %v3167_v9  ;;  %6072 = vmatprep.mubr.msk.f32.mxu0 %vm6551_vm3, %v6548_v51  ;;  %v3550_v26 = vsel %vm1349_vm5, %v5494_v50, 0 }
 0x6d8   :  { %v3556_v29 = vand.u32 4294901760, %v3550_v26  ;;  %v4107_v15 = vand.u32 4294901760, %v4106_v62 }
 0x6d9   :  { %6314 = vmatpush3.bf16.msra.mxu0 %v6313_v17  ;;  %v3169_v23 = vand.u32 4294901760, %v3168_v19 }
 0x6da   :  { %6070 = vmatprep.subr.mxu0 %v6548_v51  ;;  %v3638_v36 = vsub.f32 %v3550_v26, %v3556_v29  ;;  %v6328_v56 = vpack.c.bf16 %v3556_v29, %v3553_v27  ;;  %v6349_v37 = vpack.c.bf16 %v4107_v15, %v4100_v35 }
 0x6dc   :  { %v3639_v41 = vand.u32 4294901760, %v3638_v36  ;;  %v6334_v7 = vpack.c.bf16 %v3638_v36, %v3631_v33 }
 0x6dd   :  { %6071 = vmatpush3.msra.mxu0 %v3169_v23 }
 0x6de   :  { %6073 = vmatmul.mubr.msk.f32.vlgmr.msra.gmra.mrb[10].mxu0 %vm868_vm4, %v6830_v32  ;;  %6315 = vmatprep.subr.bf16.mxu0 %v6550_v21  ;;  %v3640_v43 = vsub.f32 %v3638_v36, %v3639_v41 }
 0x6df   :  { %6317 = vmatpush3.bf16.msra.mxu0 %v6316_v55  ;;  %6081 = vmatprep.mubr.msk.f32.mxu0 %vm6551_vm3, %v6548_v51 }
 0x6e0   :  { %6079 = vmatprep.subr.mxu0 %v6548_v51  ;;  %v3641_v1 = vand.u32 4294901760, %v3640_v43 }
 0x6e3   :  { %6080 = vmatpush3.msra.mxu0 %v3166_v59 }
 0x6e4   :  { %6318 = vmatprep.subr.bf16.mxu0 %v6550_v21 }
 0x6e6   :  { %6082 = vmatmul.mubr.f32.vlgmr.msra.gmra.mrb[10].mxu0 %v6838_v60  ;;  %v3547_v60 = vsel %vm755_vm2, %v6945_v63, 0 }
 0x6e7   :  { %6320 = vmatpush3.bf16.msra.mxu0 %v6310_v42  ;;  %6090 = vmatprep.mubr.msk.f32.mxu0 %vm6551_vm3, %v6548_v51  ;;  %v3619_v38 = vand.u32 4294901760, %v3547_v60 }
 0x6e8   :  { %6088 = vmatprep.subr.mxu0 %v6548_v51 }
 0x6e9   :  { %v3620_v14 = vsub.f32 %v3547_v60, %v3619_v38 }
 0x6eb   :  { %6089 = vmatpush3.msra.mxu0 %v3079_v45  ;;  %v3621_v44 = vand.u32 4294901760, %v3620_v14 }
 0x6ec   :  { %6321 = vmatprep.subr.bf16.mxu0 %v6550_v21 }
 0x6ed   :  { %v3622_v13 = vsub.f32 %v3620_v14, %v3621_v44 }
 0x6ee   :  { %6091 = vmatmul.mubr.f32.vlgmr.msra.gmra.mrb[10].mxu0 %v6845_v53  ;;  %v3633_v53 = vsub.f32 %v3631_v33, %v3632_v39 }
 0x6ef   :  { %6323 = vmatpush3.bf16.msra.mxu0 %v6322_v5  ;;  %6099 = vmatprep.mubr.msk.f32.mxu0 %vm6551_vm3, %v6548_v51  ;;  %v3623_v3 = vand.u32 4294901760, %v3622_v13 }
 0x6f0   :  { %6097 = vmatprep.subr.mxu0 %v6548_v51  ;;  %v3634_v58 = vand.u32 4294901760, %v3633_v53 }
 0x6f2   :  { %v6331_v34 = vpack.c.bf16 %v3641_v1, %v3634_v58 }
 0x6f3   :  { %6098 = vmatpush3.msra.mxu0 %v3167_v9 }
 0x6f4   :  { %6324 = vmatprep.subr.bf16.mxu0 %v6550_v21 }
 0x6f6   :  { %6100 = vmatmul.mubr.msk.f32.vlgmr.msra.gmra.mrb[10].mxu0 %vm868_vm4, %v6830_v32 }
 0x6f7   :  { %6326 = vmatpush3.bf16.msra.mxu0 %v6310_v42  ;;  %6108 = vmatprep.mubr.msk.f32.mxu0 %vm6551_vm3, %v6548_v51 }
 0x6f8   :  { %6106 = vmatprep.subr.mxu0 %v6548_v51 }
 0x6fb   :  { %6107 = vmatpush3.msra.mxu0 %v3079_v45 }
 0x6fc   :  { %6327 = vmatprep.subr.bf16.mxu0 %v6550_v21 }
 0x6fe   :  { %6109 = vmatmul.mubr.msk.f32.vlgmr.msra.gmra.mrb[10].mxu0 %vm868_vm4, %v6830_v32  ;;  %v6340_v32 = vpack.c.bf16 %v3639_v41, %v3632_v39 }
 0x6ff   :  { %6329 = vmatpush3.bf16.msra.mxu0 %v6328_v56  ;;  %6115 = vmatprep.mubr.msk.f32.mxu0 %vm6551_vm3, %v6548_v51 }
 0x700   :  { %6330 = vmatprep.subr.bf16.mxu0 %v6550_v21 }
 0x702   :  { %6116 = vmatmul.mubr.f32.vlgmr.msra.gmra.mrb[12].mxu0 %v3623_v3 }
 0x703   :  { %6332 = vmatpush3.bf16.msra.mxu0 %v6331_v34  ;;  %6122 = vmatprep.mubr.msk.f32.mxu0 %vm6551_vm3, %v6548_v51 }
 0x704   :  { %6333 = vmatprep.subr.bf16.mxu0 %v6550_v21 }
 0x706   :  { %6123 = vmatmul.mubr.f32.vlgmr.msra.gmra.mrb[14].mxu0 %v3619_v38 }
 0x707   :  { %6335 = vmatpush3.bf16.msra.mxu0 %v6334_v7  ;;  %6129 = vmatprep.mubr.msk.f32.mxu0 %vm6551_vm3, %v6548_v51 }
 0x708   :  { %6336 = vmatprep.subr.bf16.mxu0 %v6550_v21 }
 0x70a   :  { %6130 = vmatmul.mubr.f32.vlgmr.msra.gmra.mrb[16].mxu0 %v3620_v14 }
 0x70b   :  { %6338 = vmatpush3.bf16.msra.mxu0 %v6328_v56  ;;  %6136 = vmatprep.mubr.msk.f32.mxu0 %vm6551_vm3, %v6548_v51 }
 0x70c   :  { %6339 = vmatprep.subr.bf16.mxu0 %v6550_v21 }
 0x70e   :  { %6137 = vmatmul.mubr.f32.vlgmr.msra.gmra.mrb[18].mxu0 %v3621_v44 }
 0x70f   :  { %6341 = vmatpush3.bf16.msra.mxu0 %v6340_v32  ;;  %6143 = vmatprep.mubr.msk.f32.mxu0 %vm6551_vm3, %v6548_v51 }
 0x710   :  { %6342 = vmatprep.subr.bf16.mxu0 %v6550_v21 }
 0x712   :  { %6144 = vmatmul.mubr.f32.vlgmr.msra.gmra.mrb[20].mxu0 %v3619_v38 }
 0x713   :  { %6344 = vmatpush3.bf16.msra.mxu0 %v6328_v56  ;;  %6150 = vmatprep.mubr.msk.f32.mxu0 %vm6551_vm3, %v6548_v51 }
 0x714   :  { %6345 = vmatprep.subr.bf16.mxu0 %v6550_v21 }
 0x716   :  { %6151 = vmatmul.mubr.f32.vlgmr.msra.gmra.mrb[22].mxu0 %v3619_v38 }
 0x717   :  { %6157 = vmatprep.mubr.msk.f32.mxu0 %vm6551_vm3, %v6548_v51  ;;  %6347 = vmatpush3.bf16.msra.mxu0 %v6346_v18 }
 0x718   :  { %6348 = vmatprep.subr.bf16.mxu0 %v6550_v21 }
 0x7d1   :  { %v3540_v42 = vpop.f32.mrb[10].mxu0 }
 0x7d2   :  { %v4013_v2 = vsel %vm755_vm2, %v3540_v42, 0  ;;  %v6110_v16 = vpop.f32.mrb[11].mxu0  ;;  %v3544_v60 = vadd.f32 %v3540_v42, %v6945_v63 }
 0x7d3   :  { %v4085_v45 = vand.u32 4294901760, %v4013_v2 }
 0x7d4   :  { %v3545_v39 = vmul.f32 %v6761_v52, %v3544_v60 }
 0x7d5   :  { %v4086_v4 = vsub.f32 %v4013_v2, %v4085_v45  ;;  %v3625_v55 = vpop.f32.mrb[12].mxu0 }
 0x7d6   :  { %v6117_v59 = vpop.f32.mrb[13].mxu0 }
 0x7d7   :  { %v4087_v48 = vand.u32 4294901760, %v4086_v4 }
 0x7d9   :  { %v4088_v5 = vsub.f32 %v4086_v4, %v4087_v48  ;;  %v3706_v8 = vpop.f32.mrb[14].mxu0  ;;  %6179 = vmatmul.mubr.f32.vlgmr.msra.gmra.mrb[28].mxu1 %v4087_v48 }
 0x7da   :  { %v3707_v6 = vadd.f32 %v3706_v8, %v3625_v55  ;;  %v6124_v9 = vpop.f32.mrb[15].mxu0  ;;  %6362 = vmatpush3.bf16.msra.mxu1 %v6346_v18  ;;  %6192 = vmatprep.mubr.msk.f32.mxu1 %vm6551_vm3, %v6548_v51 }
 0x7db   :  { %v4089_v17 = vand.u32 4294901760, %v4088_v5  ;;  %6225 = vmatprep.subr.mxu1 %v6548_v51 }
 0x7dd   :  { %v3782_v19 = vpop.f32.mrb[16].mxu0  ;;  %6158 = vmatmul.mubr.f32.vlgmr.msra.gmra.mrb[24].mxu0 %v4089_v17  ;;  %6193 = vmatmul.mubr.f32.vlgmr.msra.gmra.mrb[30].mxu1 %v4085_v45  ;;  %v4987_v17 = vstv %s5529_s15 }
 0x7de   :  { %v3783_v23 = vadd.f32 %v3782_v19, %v3707_v6  ;;  %v6131_v50 = vpop.f32.mrb[17].mxu0  ;;  %6350 = vmatpush3.bf16.msra.mxu0 %v6349_v37  ;;  %6164 = vmatprep.mubr.msk.f32.mxu0 %vm6551_vm3, %v6548_v51 }
 0x7df   :  { %6351 = vmatprep.subr.bf16.mxu0 %v6550_v21  ;;  %6227 = vmatprep.mubr.msk.f32.mxu1 %vm6551_vm3, %v6548_v51 }
 0x7e1   :  { %v3857_v25 = vpop.f32.mrb[18].mxu0  ;;  %6165 = vmatmul.mubr.f32.vlgmr.msra.gmra.mrb[26].mxu0 %v4085_v45 }
 0x7e2   :  { %v3858_v26 = vadd.f32 %v3857_v25, %v3783_v23  ;;  %v6138_v27 = vpop.f32.mrb[19].mxu0  ;;  %6353 = vmatpush3.bf16.msra.mxu0 %v6352_v24  ;;  %6171 = vmatprep.mubr.msk.f32.mxu0 %vm6551_vm3, %v6548_v51  ;;  %v4481_v24 = vrot.slane %v7019_v10, %v2281_v12  ;;  %v5067_v12 = vsub.f32 %v4995_v49, %v4995_v49 }
 0x7e3   :  { %6357 = vmatprep.subr.bf16.mxu0 %v6550_v21  ;;  %v5552_v21 = vld [vmem:[%s7195_s0 + $0x18] sm:$0xff]   ;;  %s5528_s0 = sld [smem:[#allocation2 + $0x6]] }
 0x7e4   :  { %v5548_v43 = vunpack.c.l.bf16 %v5552_v21  ;;  %v5549_v0 = vunpack.c.h.bf16 %v5552_v21  ;;  %v5068_v9 = vand.u32 4294901760, %v5067_v12 }
 0x7e5   :  { %v3934_v29 = vpop.f32.mrb[20].mxu0  ;;  %6172 = vmatmul.mubr.f32.vlgmr.msra.gmra.mrb[28].mxu0 %v4086_v4 }
 0x7e6   :  { %v3935_v33 = vadd.f32 %v3934_v29, %v3858_v26  ;;  %v6145_v36 = vpop.f32.mrb[21].mxu0  ;;  %6359 = vmatpush3.bf16.msra.mxu0 %v6358_v40  ;;  %6185 = vmatprep.mubr.msk.f32.mxu0 %vm6551_vm3, %v6548_v51  ;;  %v4488_v63 = vsel %vm66_vm0, %v5548_v43, 0  ;;  %v4491_v11 = vsel %vm66_vm0, %v5549_v0, 0  ;;  %v5069_v26 = vsub.f32 %v5067_v12, %v5068_v9 }
 0x7e7   :  { %v4560_v44 = vsub.f32 %v4488_v63, %v4488_v63  ;;  %v4570_v47 = vsub.f32 %v4491_v11, %v4491_v11 }
 0x7e9   :  { %v4007_v38 = vpop.f32.mrb[22].mxu0  ;;  %6186 = vmatmul.mubr.f32.vlgmr.msra.gmra.mrb[30].mxu0 %v4085_v45  ;;  %v4561_v56 = vand.u32 4294901760, %v4560_v44  ;;  %v4571_v15 = vand.u32 4294901760, %v4570_v47  ;;  %v4990_v19 = vstv %s5528_s0 }
 0x7ea   :  { %v4008_v41 = vadd.f32 %v4007_v38, %v3935_v33  ;;  %v6152_v14 = vpop.f32.mrb[23].mxu0  ;;  %v5070_v33 = vand.u32 4294901760, %v5069_v26 }
 0x7eb   :  { %v4562_v58 = vsub.f32 %v4560_v44, %v4561_v56  ;;  %v4572_v42 = vsub.f32 %v4570_v47, %v4571_v15 }
 0x7ec   :  { %v4011_v53 = vadd.f32 %v4008_v41, %v3545_v39  ;;  %v4993_v41 = vstv %s5530_s16 }
 0x7ed   :  { %v4563_v1 = vand.u32 4294901760, %v4562_v58  ;;  %v4573_v45 = vand.u32 4294901760, %v4572_v42 }
 0x7ef   :  { %6197 = vmatprep.mubr.f32.mxu0 %v4563_v1 }
 0x8ac   :  { %v4323_v13 = vpop.f32.mrb[28].mxu1 }
 0x8ad   :  { %v6180_v34 = vpop.f32.mrb[29].mxu1 }
 0x8b0   :  { %v4091_v3 = vpop.f32.mrb[24].mxu0  ;;  %v4473_v7 = vpop.f32.mrb[30].mxu1 }
 0x8b1   :  { %v6159_v52 = vpop.f32.mrb[25].mxu0  ;;  %v6194_v32 = vpop.f32.mrb[31].mxu1 }
 0x8b4   :  { %v4172_v31 = vpop.f32.mrb[26].mxu0 }
 0x8b5   :  { %v4173_v57 = vadd.f32 %v4172_v31, %v4091_v3  ;;  %v6166_v61 = vpop.f32.mrb[27].mxu0 }
 0x8b8   :  { %v4248_v18 = vpop.f32.mrb[28].mxu0 }
 0x8b9   :  { %v4249_v22 = vadd.f32 %v4248_v18, %v4173_v57  ;;  %v6173_v20 = vpop.f32.mrb[29].mxu0 }
 0x8bb   :  { %v4324_v54 = vadd.f32 %v4323_v13, %v4249_v22 }
 0x8bc   :  { %v4400_v28 = vpop.f32.mrb[30].mxu0 }
 0x8bd   :  { %v4401_v62 = vadd.f32 %v4400_v28, %v4324_v54  ;;  %v6187_v35 = vpop.f32.mrb[31].mxu0 }
 0x8bf   :  { %v4474_v37 = vadd.f32 %v4473_v7, %v4401_v62 }
 0x8c1   :  { %v4477_v40 = vadd.f32 %v4474_v37, %v4011_v53 }
 0x8c3   :  { %v4482_v2 = vadd.f32 %v4481_v24, %v4477_v40 }
 0x8c5   :  { %v4494_v16 = vand.u32 4294901760, %v4482_v2 }
 0x8c7   :  { %v4581_v4 = vsub.f32 %v4482_v2, %v4494_v16  ;;  %6195 = vmatprep.subr.mxu0 %v4494_v16 }
 0x8c8   :  { %6196 = vmatpush3.msra.mxu0 %v4494_v16 }
 0x8c9   :  { %6198 = vmatmul.mubr.f32.vlgmr.msra.gmra.mrb[32].mxu0 %v4573_v45  ;;  %v4582_v55 = vand.u32 4294901760, %v4581_v4 }
 0x8ca   :  { %6202 = vmatprep.mubr.msk.f32.mxu0 %vm66_vm0, %v5548_v43 }
 0x8cb   :  { %v4583_v59 = vsub.f32 %v4581_v4, %v4582_v55 }
 0x8cd   :  { %v4584_v48 = vand.u32 4294901760, %v4583_v59 }
 0x8cf   :  { %6200 = vmatprep.subr.mxu0 %v4584_v48 }
 0x8d0   :  { %6201 = vmatpush3.msra.mxu0 %v4584_v48 }
 0x8d1   :  { %6203 = vmatmul.mubr.msk.f32.vlgmr.msra.gmra.mrb[32].mxu0 %vm66_vm0, %v5549_v0  ;;  %6205 = vmatprep.subr.mxu0 %v4581_v4 }
 0x8d2   :  { %6206 = vmatpush3.msra.mxu0 %v4581_v4  ;;  %6207 = vmatprep.mubr.f32.mxu0 %v4560_v44 }
 0x8d3   :  { %6210 = vmatprep.subr.mxu0 %v4494_v16 }
 0x8d9   :  { %6208 = vmatmul.mubr.f32.vlgmr.msra.gmra.mrb[32].mxu0 %v4570_v47 }
 0x8da   :  { %6211 = vmatpush3.msra.mxu0 %v4494_v16  ;;  %6212 = vmatprep.mubr.f32.mxu0 %v4561_v56 }
 0x8db   :  { %6215 = vmatprep.subr.mxu0 %v4582_v55 }
 0x8e1   :  { %6213 = vmatmul.mubr.f32.vlgmr.msra.gmra.mrb[32].mxu0 %v4571_v15 }
 0x8e2   :  { %6216 = vmatpush3.msra.mxu0 %v4582_v55  ;;  %6217 = vmatprep.mubr.msk.f32.mxu0 %vm66_vm0, %v5548_v43 }
 0x8e3   :  { %6220 = vmatprep.subr.mxu0 %v4494_v16 }
 0x8e9   :  { %6218 = vmatmul.mubr.msk.f32.vlgmr.msra.gmra.mrb[32].mxu0 %vm66_vm0, %v5549_v0 }
 0x8ea   :  { %6221 = vmatpush3.msra.mxu0 %v4494_v16  ;;  %6222 = vmatprep.mubr.msk.f32.mxu0 %vm66_vm0, %v5548_v43 }
 0x8f1   :  { %6223 = vmatmul.mubr.msk.f32.vlgmr.msra.gmra.mrb[32].mxu0 %vm66_vm0, %v5549_v0 }
 0x9c4   :  { %v6224_v10 = vpop.f32.mrb[32].mxu0 }
 0x9c5   :  { %v4972_v5 = vpop.f32.mrb[33].mxu0 }
 0x9c6   :  { %v4985_v8 = vsub.f32 %v4972_v5, %v6224_v10  ;;  %v4989_v6 = vmul.f32 %v6224_v10, %v4972_v5 }
 0x9c8   :  { %v4986_v23 = vmul.f32 %v4985_v8, %v4985_v8  ;;  %v4991_v25 = vmul.f32 %v4990_v19, %v4989_v6 }
 0x9ca   :  { %v4988_v50 = vmul.f32 %v4987_v17, %v4986_v23 }
 0x9cc   :  { %v4992_v27 = vsel %vm39_vm1, %v4988_v50, %v4991_v25 }
 0x9cd   :  { %v4998_v29 = vsel %vm755_vm2, %v4992_v27, 0 }
 0x9ce   :  { %v5001_v60 = vand.u32 4294901760, %v4998_v29 }
 0x9d0   :  { %6226 = vmatpush3.xpose.msra.mxu1 %v5001_v60  ;;  %v5078_v30 = vsub.f32 %v4998_v29, %v5001_v60 }
 0x9d1   :  { %6230 = vmatprep.subr.mxu1 %v6548_v51 }
 0x9d2   :  { %v5079_v36 = vand.u32 4294901760, %v5078_v30 }
 0x9d3   :  { %6228 = vmatmul.mubr.f32.vlgmr.msra.gmra.mrb[32].mxu1 %v5070_v33 }
 0x9d4   :  { %v5080_v38 = vsub.f32 %v5078_v30, %v5079_v36  ;;  %6232 = vmatprep.mubr.msk.f32.mxu1 %vm6551_vm3, %v6548_v51 }
 0x9d6   :  { %v5081_v39 = vand.u32 4294901760, %v5080_v38 }
 0x9d8   :  { %6231 = vmatpush3.xpose.msra.mxu1 %v5081_v39 }
 0x9d9   :  { %6235 = vmatprep.subr.mxu1 %v6548_v51 }
 0x9db   :  { %6233 = vmatmul.mubr.msk.f32.vlgmr.msra.gmra.mrb[32].mxu1 %vm755_vm2, %v6552_v46 }
 0x9dc   :  { %6236 = vmatpush3.xpose.msra.mxu1 %v5078_v30  ;;  %6237 = vmatprep.mubr.msk.f32.mxu1 %vm6551_vm3, %v6548_v51 }
 0x9dd   :  { %6240 = vmatprep.subr.mxu1 %v6548_v51 }
 0x9e3   :  { %6238 = vmatmul.mubr.f32.vlgmr.msra.gmra.mrb[32].mxu1 %v5067_v12 }
 0x9e4   :  { %6241 = vmatpush3.xpose.msra.mxu1 %v5001_v60  ;;  %6242 = vmatprep.mubr.msk.f32.mxu1 %vm6551_vm3, %v6548_v51 }
 0x9e5   :  { %6245 = vmatprep.subr.mxu1 %v6548_v51 }
 0x9eb   :  { %6243 = vmatmul.mubr.f32.vlgmr.msra.gmra.mrb[32].mxu1 %v5068_v9 }
 0x9ec   :  { %6246 = vmatpush3.xpose.msra.mxu1 %v5079_v36  ;;  %6247 = vmatprep.mubr.msk.f32.mxu1 %vm6551_vm3, %v6548_v51 }
 0x9ed   :  { %6250 = vmatprep.subr.mxu1 %v6548_v51 }
 0x9f3   :  { %6248 = vmatmul.mubr.msk.f32.vlgmr.msra.gmra.mrb[32].mxu1 %vm755_vm2, %v6552_v46 }
 0x9f4   :  { %6251 = vmatpush3.xpose.msra.mxu1 %v5001_v60  ;;  %6252 = vmatprep.mubr.msk.f32.mxu1 %vm6551_vm3, %v6548_v51 }
 0x9fb   :  { %6253 = vmatmul.mubr.msk.f32.vlgmr.msra.gmra.mrb[32].mxu1 %vm755_vm2, %v6552_v46 }
 0xace   :  { %v5442_v14 = vpop.f32.mrb[32].mxu1 }
 0xacf   :  { %v6363_v53 = vadd.f32 %v5442_v14, %v4993_v41  ;;  %v6254_v21 = vpop.f32.mrb[33].mxu1 }
 0xad1   :  { %5447 = vst.msk [vmem:[#allocation5] sm:$0x1] %vm5446_vm6, %v6363_v53 }
 0xad2   :  { %6532 = shalt.err (!%p6529_p9)
}
 0xad3   :  { %s6533_s21 = scalar_lea.hbm %s7201_s6, 16 }
 0xad4   :  { %p6534_p10 = scmp.ne.s32.totalorder %s7201_s6, %s6533_s21  ;;  %p6537_p11 = scmp.lt.u32.totalorder %s6533_s21, %s7201_s6 }
 0xad6   :  { %p6539_p12 = pnand %p6537_p11, %p6534_p10 }
 0xad8   :  { %6542 = shalt.err (!%p6539_p12)
}
 0xad9   :  { %5457 = dma.vmem_to_hbm [thread:$0]  %s5455_s18, 16, %s7201_s6, [#allocation3]  }
 0xada   :  { %6545 = dma.done.wait [#allocation3], 16  }
 0xadb   :  { %6546 = vsyncadd [#allocation3], 4294967280 }
 0xadc   :  { %5461 = vsyncpa [#allocation3], 1 }
 0xadd   :  { %5462 = vsyncpa [#allocation4], 1 }

</bundles_post_ra>
